<compile_context>
chip_gen: v6e
topology: v6e:2x2x1
jax: 0.10.0
libtpu: 0.0.40
codegen_flags: <defaults>
</compile_context>

<pallas_src>
import functools

import numpy as np
import jax
import jax.numpy as jnp
from jax.experimental import pallas as pl
from jax.experimental.pallas import tpu as pltpu


# ---------------------------------------------------------------------------
# Pallas kernel: Bt graphs per program, block-diagonal operators, flat features
# ---------------------------------------------------------------------------
def _graphcnn_kernel(num_pool_layers,
                     x0_ref, abd_ref, comb_ref, mask_ref,
                     wmat_ref, bvec_ref, seg_ref, wout_ref, bout_ref,
                     out_ref):
    f32, bf16 = jnp.float32, jnp.bfloat16
    L = num_pool_layers

    # GCNConv: x = A_norm_blockdiag @ (x0 @ Wgcn) + bgcn
    xw = jnp.dot(x0_ref[...], wmat_ref[0],
                 preferred_element_type=f32)                      # (BN, D) f32
    x = jnp.dot(abd_ref[0], xw.astype(bf16),
                preferred_element_type=f32) + bvec_ref[0]         # (BN, D) f32

    for j in range(L):
        # fused RT pooling + GIN aggregation:  (M_j @ RT_j)_blockdiag @ x
        h = jnp.dot(comb_ref[j, 0], x.astype(bf16),
                    preferred_element_type=f32)                   # (BN, D) f32
        # GIN MLP (Linear -> ReLU -> Linear), then the outer ReLU
        h = jnp.maximum(
            jnp.dot(h.astype(bf16), wmat_ref[1 + j],
                    preferred_element_type=f32) + bvec_ref[1 + j], 0.0)
        h = (jnp.dot(h.astype(bf16), wmat_ref[1 + L + j],
                     preferred_element_type=f32) + bvec_ref[1 + L + j])
        x = jnp.maximum(h, 0.0)                                   # (BN, D) f32

    # attention pooling: rep[g] = sum_n mask[g,n] * x[g,n,:] * (x[g,n,:] @ w)
    # mask folded into the per-node scalar (one (BN,1) mul instead of (BN,D)).
    att = jnp.sum(x * bvec_ref[1 + 2 * L], axis=-1, keepdims=True) * mask_ref[...]
    rep = jnp.dot(seg_ref[...], x * att, preferred_element_type=f32)  # (Bt, D)

    # final linear into a lane-dense (Bt, OPAD) slab (Wout/bout zero-padded)
    out_ref[...] = (jnp.dot(rep, wout_ref[...], preferred_element_type=f32)
                    + bout_ref[...])


def _block_diag(ops, bt):
    """(S*bt, n, n) -> (S, bt*n, bt*n) block-diagonal (zero off-diag blocks)."""
    total, n, _ = ops.shape
    s = total // bt
    ops = ops.reshape(s, bt, n, n)
    eye = jnp.eye(bt, dtype=ops.dtype)
    bd = jnp.einsum('sgij,gh->sgihj', ops, eye)
    return bd.reshape(s, bt * n, bt * n)


def graphcnn_forward(x0, a0, comb, mask,
                     wgcn, bgcn, w1, b1, w2, b2, watt, wout, bout,
                     *, block_b=None):
    B, NMAX, D = x0.shape
    L = comb.shape[0]
    O = wout.shape[1]
    OPAD = -(-O // 128) * 128

    f32, bf16 = jnp.float32, jnp.bfloat16

    # graphs per grid step: default targets a 128-row block-diagonal operator
    # (one full v5e MXU tile).  For v6e/v7x consider 256; on v7x also ensure
    # n_steps >= 4 so both TensorCores pipeline.
    if block_b is None:
        block_b = max(8, -(-128 // NMAX))
    Bt = block_b
    Bp = -(-B // Bt) * Bt
    n_steps = Bp // Bt
    BN = Bt * NMAX
    assert BN % 8 == 0, "Bt*NMAX must be a multiple of 8 (sublane tiling)"
    assert n_steps == 1 or Bt % 8 == 0, "Bt must be a multiple of 8 if n_steps>1"

    # big per-graph operands in bf16 (f32 accumulation on the MXU)
    x0 = jnp.asarray(x0, bf16)
    a0 = jnp.asarray(a0, bf16)
    comb = jnp.asarray(comb, bf16)
    mask = jnp.asarray(mask, f32)

    if Bp != B:
        pad_b = Bp - B
        x0 = jnp.pad(x0, ((0, pad_b), (0, 0), (0, 0)))
        a0 = jnp.pad(a0, ((0, pad_b), (0, 0), (0, 0)))
        comb = jnp.pad(comb, ((0, 0), (0, pad_b), (0, 0), (0, 0)))
        mask = jnp.pad(mask, ((0, pad_b), (0, 0), (0, 0)))

    # flat node layout + host block-diagonal packing of the per-graph operators
    x0_flat = x0.reshape(Bp * NMAX, D)
    mask_flat = mask.reshape(Bp * NMAX, 1)
    a_bd = _block_diag(a0, Bt)                                        # (S,BN,BN)
    comb_bd = jnp.stack([_block_diag(comb[j], Bt) for j in range(L)], axis=0)

    # packed small-weight slabs: matrices bf16, biases + attention vector f32
    wmats = jnp.concatenate(
        [jnp.asarray(wgcn, bf16)[None],
         jnp.asarray(w1, bf16),
         jnp.asarray(w2, bf16)], axis=0)                              # (1+2L,D,D)
    bvecs = jnp.concatenate(
        [jnp.asarray(bgcn, f32).reshape(1, 1, D),
         jnp.asarray(b1, f32).reshape(L, 1, D),
         jnp.asarray(b2, f32).reshape(L, 1, D),
         jnp.asarray(watt, f32).reshape(1, 1, D)], axis=0)            # (2+2L,1,D)

    # per-graph segment-sum matrix (same every step): S[g, g*NMAX + n] = 1
    seg = jnp.kron(jnp.eye(Bt, dtype=f32), jnp.ones((1, NMAX), f32))  # (Bt, BN)

    # lane-dense output: pad the final linear to OPAD output lanes
    wout_p = jnp.zeros((D, OPAD), f32).at[:, :O].set(jnp.asarray(wout, f32))
    bout_p = jnp.zeros((1, OPAD), f32).at[:, :O].set(jnp.asarray(bout, f32))

    kernel = functools.partial(_graphcnn_kernel, L)

    flops_per_step = (2 * BN * D * D + 2 * BN * BN * D
                      + L * (2 * BN * BN * D + 4 * BN * D * D)
                      + 4 * BN * D + 2 * Bt * BN * D + 2 * Bt * D * OPAD)
    inputs = (x0_flat, a_bd, comb_bd, mask_flat, wmats, bvecs, seg,
              wout_p, bout_p)
    bytes_accessed = int(sum(int(a.size) * a.dtype.itemsize for a in inputs)
                         + Bp * OPAD * 4)
    cost = pl.CostEstimate(flops=int(n_steps * flops_per_step),
                           transcendentals=0,
                           bytes_accessed=bytes_accessed)

    out = pl.pallas_call(
        kernel,
        out_shape=jax.ShapeDtypeStruct((Bp, OPAD), jnp.float32),
        grid_spec=pltpu.PrefetchScalarGridSpec(
            num_scalar_prefetch=0,
            grid=(n_steps,),
            in_specs=[
                pl.BlockSpec((BN, D), lambda b: (b, 0)),                # x0_flat
                pl.BlockSpec((1, BN, BN), lambda b: (b, 0, 0)),         # a_bd
                pl.BlockSpec((L, 1, BN, BN), lambda b: (0, b, 0, 0)),   # comb_bd
                pl.BlockSpec((BN, 1), lambda b: (b, 0)),                # mask
                pl.BlockSpec((1 + 2 * L, D, D), lambda b: (0, 0, 0)),   # wmats
                pl.BlockSpec((2 + 2 * L, 1, D), lambda b: (0, 0, 0)),   # bvecs
                pl.BlockSpec((Bt, BN), lambda b: (0, 0)),               # seg
                pl.BlockSpec((D, OPAD), lambda b: (0, 0)),              # wout_p
                pl.BlockSpec((1, OPAD), lambda b: (0, 0)),              # bout_p
            ],
            out_specs=pl.BlockSpec((Bt, OPAD), lambda b: (b, 0)),
        ),
        compiler_params=pltpu.CompilerParams(
            dimension_semantics=("parallel",),
            vmem_limit_bytes=32 * 1024 * 1024),
        cost_estimate=cost,
    )(x0_flat, a_bd, comb_bd, mask_flat, wmats, bvecs, seg, wout_p, bout_p)

    return out[:B, :O]


# ---------------------------------------------------------------------------
# Glue: build dense padded graph operators
# ---------------------------------------------------------------------------
def gcn_norm_adj(edges, n, nmax):
    A = np.zeros((nmax, nmax), dtype=np.float32)
    for (i, j) in edges:
        A[i, j] = 1.0
        A[j, i] = 1.0
    A[:n, :n] += np.eye(n, dtype=np.float32)          # self loops
    deg = A[:n, :n].sum(axis=1)
    dinv = 1.0 / np.sqrt(np.maximum(deg, 1e-12))
    A[:n, :n] = dinv[:, None] * A[:n, :n] * dinv[None, :]
    return A


def gin_agg_mat(edges, n, nmax, eps=0.0):
    M = np.zeros((nmax, nmax), dtype=np.float32)
    for (i, j) in edges:
        M[i, j] = 1.0
        M[j, i] = 1.0
    M[:n, :n] += (1.0 + eps) * np.eye(n, dtype=np.float32)
    return M


def cluster_mat(assign, n_in, nmax):
    """assign: list of clusters (each a list of input-node ids)."""
    C = np.zeros((nmax, nmax), dtype=np.float32)
    for k, members in enumerate(assign):
        for nidx in members:
            C[k, nidx] = 1.0
    return C


# ---------------------------------------------------------------------------
# Pure numpy reference (unpadded, per-graph), mirrors the torch module
# ---------------------------------------------------------------------------
def reference_forward(graphs, weights):
    (wgcn, bgcn, w1, b1, w2, b2, watt, wout, bout) = weights
    scores = []
    for g in graphs:
        nlv = g["n_levels"]
        x = g["x"][: nlv[0]]
        A0 = g["a0"][: nlv[0], : nlv[0]]
        x = A0 @ (x @ wgcn) + bgcn
        for j in range(len(nlv) - 1):
            RT = g["rt"][j][: nlv[j + 1], : nlv[j]]
            M = g["m"][j][: nlv[j + 1], : nlv[j + 1]]
            h = M @ (RT @ x)
            h = np.maximum(h @ w1[j] + b1[j], 0.0)
            h = h @ w2[j] + b2[j]
            x = np.maximum(h, 0.0)
        rep = (x.T @ (x @ watt)).reshape(-1)
        scores.append(rep @ wout + bout.reshape(-1))
    return np.stack(scores)


def _q_bf16(a):
    return np.asarray(jnp.asarray(a, jnp.bfloat16).astype(jnp.float32))


# ---------------------------------------------------------------------------
if __name__ == "__main__":
    B = 32         # batch of graphs
    NMAX = 8       # padded node count
    D = 16         # input_dim
    O = 4          # output_dim (num classes)
    L = 2          # num_pooling_layers
    Bt = 16        # graphs/step -> 128-row block-diagonal operator, 2 grid steps

    key = jax.random.PRNGKey(0)
    keys = jax.random.split(key, 12)

    # --- deterministic weights (shapes from the module's __init__) ---
    wgcn = 0.1 * jax.random.normal(keys[0], (D, D), jnp.float32)
    bgcn = 0.05 * jax.random.normal(keys[1], (1, D), jnp.float32)
    w1 = 0.1 * jax.random.normal(keys[2], (L, D, D), jnp.float32)
    b1 = 0.05 * jax.random.normal(keys[3], (L, 1, D), jnp.float32)
    w2 = 0.1 * jax.random.normal(keys[4], (L, D, D), jnp.float32)
    b2 = 0.05 * jax.random.normal(keys[5], (L, 1, D), jnp.float32)
    watt = 0.1 * jax.random.normal(keys[6], (D, 1), jnp.float32)   # self.w
    wout = 0.1 * jax.random.normal(keys[7], (D, O), jnp.float32)   # linear1
    bout = 0.05 * jax.random.normal(keys[8], (1, O), jnp.float32)

    # --- synthetic graphs with RT pooling hierarchies (two topologies cycled) ---
    base_defs = [
        dict(n_levels=[6, 3, 2],
             edges0=[(0, 1), (1, 2), (2, 3), (3, 4), (4, 5), (5, 0)],
             clusters=[[[0, 1], [2, 3], [4, 5]], [[0, 1], [2]]],
             pooled_edges=[[(0, 1), (1, 2), (0, 2)], [(0, 1)]]),
        dict(n_levels=[5, 3, 2],
             edges0=[(0, 1), (1, 2), (2, 3), (3, 4), (0, 4)],
             clusters=[[[0, 1], [2, 3], [4]], [[0], [1, 2]]],
             pooled_edges=[[(0, 1), (1, 2), (0, 2)], [(0, 1)]]),
    ]
    graph_defs = [base_defs[i % 2] for i in range(B)]

    x0_np = np.zeros((B, NMAX, D), dtype=np.float32)
    a0_np = np.zeros((B, NMAX, NMAX), dtype=np.float32)
    rt_np = np.zeros((B, L, NMAX, NMAX), dtype=np.float32)
    m_np = np.zeros((B, L, NMAX, NMAX), dtype=np.float32)
    comb_np = np.zeros((L, B, NMAX, NMAX), dtype=np.float32)   # fused M @ RT
    mask_np = np.zeros((B, NMAX, 1), dtype=np.float32)

    feat_keys = jax.random.split(keys[9], B)
    for gi, gd in enumerate(graph_defs):
        nlv = gd["n_levels"]
        feats = np.asarray(
            jax.random.normal(feat_keys[gi], (nlv[0], D), jnp.float32))
        x0_np[gi, : nlv[0]] = feats
        a0_np[gi] = gcn_norm_adj(gd["edges0"], nlv[0], NMAX)
        for j in range(L):
            rt_np[gi, j] = cluster_mat(gd["clusters"][j], nlv[j], NMAX)
            m_np[gi, j] = gin_agg_mat(gd["pooled_edges"][j], nlv[j + 1], NMAX)
            comb_np[j, gi] = m_np[gi, j] @ rt_np[gi, j]
            # padding invariant required by the kernel: fused operator must be
            # zero on padded rows/columns so bias garbage never propagates.
            assert np.all(comb_np[j, gi, nlv[j + 1]:, :] == 0.0)
            assert np.all(comb_np[j, gi, :, nlv[j]:] == 0.0)
        mask_np[gi, : nlv[-1], 0] = 1.0

    # bf16-quantized copies for the reference (the kernel ships x0/a0 and the
    # weight matrices as bf16; comb is integer-valued and exact in bf16).
    x0_q, a0_q = _q_bf16(x0_np), _q_bf16(a0_np)

    graphs_ref = []
    for gi, gd in enumerate(graph_defs):
        graphs_ref.append(dict(
            n_levels=gd["n_levels"],
            x=x0_q[gi].copy(), a0=a0_q[gi].copy(),
            rt=[rt_np[gi, j].copy() for j in range(L)],
            m=[m_np[gi, j].copy() for j in range(L)]))

    out = graphcnn_forward(
        jnp.asarray(x0_np), jnp.asarray(a0_np), jnp.asarray(comb_np),
        jnp.asarray(mask_np),
        wgcn, bgcn, w1, b1, w2, b2, watt, wout, bout, block_b=Bt)
    out = jax.block_until_ready(out)

    weights_np = (_q_bf16(wgcn), np.asarray(bgcn), _q_bf16(w1), np.asarray(b1),
                  _q_bf16(w2), np.asarray(b2), np.asarray(watt),
                  np.asarray(wout), np.asarray(bout))
    ref = reference_forward(graphs_ref, weights_np)

    out_np = np.asarray(out, dtype=np.float32)
    # tolerance relaxed for bf16 operands with f32 accumulation
    if not np.allclose(out_np, ref, rtol=5e-2, atol=5e-2):
        raise AssertionError(
            f"mismatch (max abs err {np.max(np.abs(out_np - ref))}):\n"
            f"kernel=\n{out_np}\nref=\n{ref}")

    print("KERNEL_OK")
</pallas_src>

<mosaic_0001>
module attributes {stable_mosaic.version = 11 : i64} {
  func.func @_graphcnn_kernel(%arg0: i32, %arg1: memref<128x16xbf16, #tpu.memory_space<vmem>>, %arg2: memref<1x128x128xbf16, #tpu.memory_space<vmem>>, %arg3: memref<2x1x128x128xbf16, #tpu.memory_space<vmem>>, %arg4: memref<128x1xf32, #tpu.memory_space<vmem>>, %arg5: memref<5x16x16xbf16, #tpu.memory_space<vmem>>, %arg6: memref<6x1x16xf32, #tpu.memory_space<vmem>>, %arg7: memref<16x128xf32, #tpu.memory_space<vmem>>, %arg8: memref<16x128xf32, #tpu.memory_space<vmem>>, %arg9: memref<1x128xf32, #tpu.memory_space<vmem>>, %arg10: memref<16x128xf32, #tpu.memory_space<vmem>>) attributes {dimension_semantics = [#tpu.dimension_semantics<parallel>], iteration_bounds = array<i64: 2>, scalar_prefetch = 0 : i64, scratch_operands = 0 : i64, tpu.core_type = #tpu.core_type<tc>, window_params = [{transform_indices = @transform_0, window_bounds = array<i64: 128, 16>}, {transform_indices = @transform_1, window_bounds = array<i64: 1, 128, 128>}, {transform_indices = @transform_2, window_bounds = array<i64: 2, 1, 128, 128>}, {transform_indices = @transform_3, window_bounds = array<i64: 128, 1>}, {pipeline_mode = #tpu.pipeline_mode<synchronous>, transform_indices = @transform_4, window_bounds = array<i64: 5, 16, 16>}, {pipeline_mode = #tpu.pipeline_mode<synchronous>, transform_indices = @transform_5, window_bounds = array<i64: 6, 1, 16>}, {pipeline_mode = #tpu.pipeline_mode<synchronous>, transform_indices = @transform_6, window_bounds = array<i64: 16, 128>}, {pipeline_mode = #tpu.pipeline_mode<synchronous>, transform_indices = @transform_7, window_bounds = array<i64: 16, 128>}, {pipeline_mode = #tpu.pipeline_mode<synchronous>, transform_indices = @transform_8, window_bounds = array<i64: 1, 128>}, {transform_indices = @transform_9, window_bounds = array<i64: 16, 128>}]} {
    %c0 = arith.constant 0 : index
    %c0_0 = arith.constant 0 : index
    %0 = vector.load %arg1[%c0, %c0_0] : memref<128x16xbf16, #tpu.memory_space<vmem>>, vector<128x16xbf16>
    %c0_1 = arith.constant 0 : index
    %c0_2 = arith.constant 0 : index
    %c0_3 = arith.constant 0 : index
    %1 = vector.load %arg5[%c0_1, %c0_2, %c0_3] : memref<5x16x16xbf16, #tpu.memory_space<vmem>>, vector<1x16x16xbf16>
    %2 = vector.shape_cast %1 : vector<1x16x16xbf16> to vector<16x16xbf16>
    %cst = arith.constant dense<0.000000e+00> : vector<128x16xf32>
    %3 = tpu.matmul %0, %2, %cst {dimension_numbers = #tpu.dot_dimension_numbers<[1], [0], [0], [1], [0, 0, 1, 1], [], []>} : vector<128x16xbf16>, vector<16x16xbf16>, vector<128x16xf32> -> vector<128x16xf32>
    %c0_4 = arith.constant 0 : index
    %c0_5 = arith.constant 0 : index
    %c0_6 = arith.constant 0 : index
    %4 = vector.load %arg2[%c0_4, %c0_5, %c0_6] : memref<1x128x128xbf16, #tpu.memory_space<vmem>>, vector<1x128x128xbf16>
    %5 = vector.shape_cast %4 : vector<1x128x128xbf16> to vector<128x128xbf16>
    %6 = arith.truncf %3 : vector<128x16xf32> to vector<128x16xbf16>
    %cst_7 = arith.constant dense<0.000000e+00> : vector<128x16xf32>
    %7 = tpu.matmul %5, %6, %cst_7 {dimension_numbers = #tpu.dot_dimension_numbers<[1], [0], [0], [1], [0, 0, 1, 1], [], []>} : vector<128x128xbf16>, vector<128x16xbf16>, vector<128x16xf32> -> vector<128x16xf32>
    %c0_8 = arith.constant 0 : index
    %c0_9 = arith.constant 0 : index
    %c0_10 = arith.constant 0 : index
    %8 = vector.load %arg6[%c0_8, %c0_9, %c0_10] : memref<6x1x16xf32, #tpu.memory_space<vmem>>, vector<1x1x16xf32>
    %9 = vector.shape_cast %8 : vector<1x1x16xf32> to vector<1x16xf32>
    %10 = vector.broadcast %9 : vector<1x16xf32> to vector<128x16xf32>
    %11 = arith.addf %7, %10 : vector<128x16xf32>
    %c0_11 = arith.constant 0 : index
    %c0_12 = arith.constant 0 : index
    %c0_13 = arith.constant 0 : index
    %c0_14 = arith.constant 0 : index
    %12 = vector.load %arg3[%c0_11, %c0_12, %c0_13, %c0_14] : memref<2x1x128x128xbf16, #tpu.memory_space<vmem>>, vector<1x1x128x128xbf16>
    %13 = vector.shape_cast %12 : vector<1x1x128x128xbf16> to vector<128x128xbf16>
    %14 = arith.truncf %11 : vector<128x16xf32> to vector<128x16xbf16>
    %cst_15 = arith.constant dense<0.000000e+00> : vector<128x16xf32>
    %15 = tpu.matmul %13, %14, %cst_15 {dimension_numbers = #tpu.dot_dimension_numbers<[1], [0], [0], [1], [0, 0, 1, 1], [], []>} : vector<128x128xbf16>, vector<128x16xbf16>, vector<128x16xf32> -> vector<128x16xf32>
    %16 = arith.truncf %15 : vector<128x16xf32> to vector<128x16xbf16>
    %c1 = arith.constant 1 : index
    %c0_16 = arith.constant 0 : index
    %c0_17 = arith.constant 0 : index
    %17 = vector.load %arg5[%c1, %c0_16, %c0_17] : memref<5x16x16xbf16, #tpu.memory_space<vmem>>, vector<1x16x16xbf16>
    %18 = vector.shape_cast %17 : vector<1x16x16xbf16> to vector<16x16xbf16>
    %cst_18 = arith.constant dense<0.000000e+00> : vector<128x16xf32>
    %19 = tpu.matmul %16, %18, %cst_18 {dimension_numbers = #tpu.dot_dimension_numbers<[1], [0], [0], [1], [0, 0, 1, 1], [], []>} : vector<128x16xbf16>, vector<16x16xbf16>, vector<128x16xf32> -> vector<128x16xf32>
    %c1_19 = arith.constant 1 : index
    %c0_20 = arith.constant 0 : index
    %c0_21 = arith.constant 0 : index
    %20 = vector.load %arg6[%c1_19, %c0_20, %c0_21] : memref<6x1x16xf32, #tpu.memory_space<vmem>>, vector<1x1x16xf32>
    %21 = vector.shape_cast %20 : vector<1x1x16xf32> to vector<1x16xf32>
    %22 = vector.broadcast %21 : vector<1x16xf32> to vector<128x16xf32>
    %23 = arith.addf %19, %22 : vector<128x16xf32>
    %cst_22 = arith.constant 0.000000e+00 : f32
    %24 = vector.broadcast %cst_22 : f32 to vector<128x16xf32>
    %25 = arith.maximumf %23, %24 : vector<128x16xf32>
    %26 = arith.truncf %25 : vector<128x16xf32> to vector<128x16xbf16>
    %c3 = arith.constant 3 : index
    %c0_23 = arith.constant 0 : index
    %c0_24 = arith.constant 0 : index
    %27 = vector.load %arg5[%c3, %c0_23, %c0_24] : memref<5x16x16xbf16, #tpu.memory_space<vmem>>, vector<1x16x16xbf16>
    %28 = vector.shape_cast %27 : vector<1x16x16xbf16> to vector<16x16xbf16>
    %cst_25 = arith.constant dense<0.000000e+00> : vector<128x16xf32>
    %29 = tpu.matmul %26, %28, %cst_25 {dimension_numbers = #tpu.dot_dimension_numbers<[1], [0], [0], [1], [0, 0, 1, 1], [], []>} : vector<128x16xbf16>, vector<16x16xbf16>, vector<128x16xf32> -> vector<128x16xf32>
    %c3_26 = arith.constant 3 : index
    %c0_27 = arith.constant 0 : index
    %c0_28 = arith.constant 0 : index
    %30 = vector.load %arg6[%c3_26, %c0_27, %c0_28] : memref<6x1x16xf32, #tpu.memory_space<vmem>>, vector<1x1x16xf32>
    %31 = vector.shape_cast %30 : vector<1x1x16xf32> to vector<1x16xf32>
    %32 = vector.broadcast %31 : vector<1x16xf32> to vector<128x16xf32>
    %33 = arith.addf %29, %32 : vector<128x16xf32>
    %cst_29 = arith.constant 0.000000e+00 : f32
    %34 = vector.broadcast %cst_29 : f32 to vector<128x16xf32>
    %35 = arith.maximumf %33, %34 : vector<128x16xf32>
    %c1_30 = arith.constant 1 : index
    %c0_31 = arith.constant 0 : index
    %c0_32 = arith.constant 0 : index
    %c0_33 = arith.constant 0 : index
    %36 = vector.load %arg3[%c1_30, %c0_31, %c0_32, %c0_33] : memref<2x1x128x128xbf16, #tpu.memory_space<vmem>>, vector<1x1x128x128xbf16>
    %37 = vector.shape_cast %36 : vector<1x1x128x128xbf16> to vector<128x128xbf16>
    %38 = arith.truncf %35 : vector<128x16xf32> to vector<128x16xbf16>
    %cst_34 = arith.constant dense<0.000000e+00> : vector<128x16xf32>
    %39 = tpu.matmul %37, %38, %cst_34 {dimension_numbers = #tpu.dot_dimension_numbers<[1], [0], [0], [1], [0, 0, 1, 1], [], []>} : vector<128x128xbf16>, vector<128x16xbf16>, vector<128x16xf32> -> vector<128x16xf32>
    %40 = arith.truncf %39 : vector<128x16xf32> to vector<128x16xbf16>
    %c2 = arith.constant 2 : index
    %c0_35 = arith.constant 0 : index
    %c0_36 = arith.constant 0 : index
    %41 = vector.load %arg5[%c2, %c0_35, %c0_36] : memref<5x16x16xbf16, #tpu.memory_space<vmem>>, vector<1x16x16xbf16>
    %42 = vector.shape_cast %41 : vector<1x16x16xbf16> to vector<16x16xbf16>
    %cst_37 = arith.constant dense<0.000000e+00> : vector<128x16xf32>
    %43 = tpu.matmul %40, %42, %cst_37 {dimension_numbers = #tpu.dot_dimension_numbers<[1], [0], [0], [1], [0, 0, 1, 1], [], []>} : vector<128x16xbf16>, vector<16x16xbf16>, vector<128x16xf32> -> vector<128x16xf32>
    %c2_38 = arith.constant 2 : index
    %c0_39 = arith.constant 0 : index
    %c0_40 = arith.constant 0 : index
    %44 = vector.load %arg6[%c2_38, %c0_39, %c0_40] : memref<6x1x16xf32, #tpu.memory_space<vmem>>, vector<1x1x16xf32>
    %45 = vector.shape_cast %44 : vector<1x1x16xf32> to vector<1x16xf32>
    %46 = vector.broadcast %45 : vector<1x16xf32> to vector<128x16xf32>
    %47 = arith.addf %43, %46 : vector<128x16xf32>
    %cst_41 = arith.constant 0.000000e+00 : f32
    %48 = vector.broadcast %cst_41 : f32 to vector<128x16xf32>
    %49 = arith.maximumf %47, %48 : vector<128x16xf32>
    %50 = arith.truncf %49 : vector<128x16xf32> to vector<128x16xbf16>
    %c4 = arith.constant 4 : index
    %c0_42 = arith.constant 0 : index
    %c0_43 = arith.constant 0 : index
    %51 = vector.load %arg5[%c4, %c0_42, %c0_43] : memref<5x16x16xbf16, #tpu.memory_space<vmem>>, vector<1x16x16xbf16>
    %52 = vector.shape_cast %51 : vector<1x16x16xbf16> to vector<16x16xbf16>
    %cst_44 = arith.constant dense<0.000000e+00> : vector<128x16xf32>
    %53 = tpu.matmul %50, %52, %cst_44 {dimension_numbers = #tpu.dot_dimension_numbers<[1], [0], [0], [1], [0, 0, 1, 1], [], []>} : vector<128x16xbf16>, vector<16x16xbf16>, vector<128x16xf32> -> vector<128x16xf32>
    %c4_45 = arith.constant 4 : index
    %c0_46 = arith.constant 0 : index
    %c0_47 = arith.constant 0 : index
    %54 = vector.load %arg6[%c4_45, %c0_46, %c0_47] : memref<6x1x16xf32, #tpu.memory_space<vmem>>, vector<1x1x16xf32>
    %55 = vector.shape_cast %54 : vector<1x1x16xf32> to vector<1x16xf32>
    %56 = vector.broadcast %55 : vector<1x16xf32> to vector<128x16xf32>
    %57 = arith.addf %53, %56 : vector<128x16xf32>
    %cst_48 = arith.constant 0.000000e+00 : f32
    %58 = vector.broadcast %cst_48 : f32 to vector<128x16xf32>
    %59 = arith.maximumf %57, %58 : vector<128x16xf32>
    %c5 = arith.constant 5 : index
    %c0_49 = arith.constant 0 : index
    %c0_50 = arith.constant 0 : index
    %60 = vector.load %arg6[%c5, %c0_49, %c0_50] : memref<6x1x16xf32, #tpu.memory_space<vmem>>, vector<1x1x16xf32>
    %61 = vector.shape_cast %60 : vector<1x1x16xf32> to vector<1x16xf32>
    %62 = vector.broadcast %61 : vector<1x16xf32> to vector<128x16xf32>
    %63 = arith.mulf %59, %62 : vector<128x16xf32>
    %cst_51 = arith.constant dense<0.000000e+00> : vector<128xf32>
    %64 = vector.multi_reduction <add>, %63, %cst_51 [1] : vector<128x16xf32> to vector<128xf32>
    %65 = vector.shape_cast %64 : vector<128xf32> to vector<128x1xf32>
    %c0_52 = arith.constant 0 : index
    %c0_53 = arith.constant 0 : index
    %66 = vector.load %arg4[%c0_52, %c0_53] : memref<128x1xf32, #tpu.memory_space<vmem>>, vector<128x1xf32>
    %67 = arith.mulf %65, %66 : vector<128x1xf32>
    %c0_54 = arith.constant 0 : index
    %c0_55 = arith.constant 0 : index
    %68 = vector.load %arg7[%c0_54, %c0_55] : memref<16x128xf32, #tpu.memory_space<vmem>>, vector<16x128xf32>
    %69 = vector.broadcast %67 : vector<128x1xf32> to vector<128x16xf32>
    %70 = arith.mulf %59, %69 : vector<128x16xf32>
    %cst_56 = arith.constant dense<0.000000e+00> : vector<16x16xf32>
    %71 = tpu.matmul %68, %70, %cst_56 {dimension_numbers = #tpu.dot_dimension_numbers<[1], [0], [0], [1], [0, 0, 1, 1], [], []>} : vector<16x128xf32>, vector<128x16xf32>, vector<16x16xf32> -> vector<16x16xf32>
    %c0_57 = arith.constant 0 : index
    %c0_58 = arith.constant 0 : index
    %72 = vector.load %arg8[%c0_57, %c0_58] : memref<16x128xf32, #tpu.memory_space<vmem>>, vector<16x128xf32>
    %cst_59 = arith.constant dense<0.000000e+00> : vector<16x128xf32>
    %73 = tpu.matmul %71, %72, %cst_59 {dimension_numbers = #tpu.dot_dimension_numbers<[1], [0], [0], [1], [0, 0, 1, 1], [], []>} : vector<16x16xf32>, vector<16x128xf32>, vector<16x128xf32> -> vector<16x128xf32>
    %c0_60 = arith.constant 0 : index
    %c0_61 = arith.constant 0 : index
    %74 = vector.load %arg9[%c0_60, %c0_61] : memref<1x128xf32, #tpu.memory_space<vmem>>, vector<1x128xf32>
    %75 = vector.broadcast %74 : vector<1x128xf32> to vector<16x128xf32>
    %76 = arith.addf %73, %75 : vector<16x128xf32>
    %c0_62 = arith.constant 0 : index
    %c0_63 = arith.constant 0 : index
    %77 = vector.load %arg10[%c0_62, %c0_63] : memref<16x128xf32, #tpu.memory_space<vmem>>, vector<16x128xf32>
    tpu.vector_store %arg10[%c0_62, %c0_63], %76 {strides = array<i32>} : memref<16x128xf32, #tpu.memory_space<vmem>>, vector<16x128xf32>,
    return
  }
  func.func @transform_0(%arg0: i32) -> (i32, i32) {
    %c0_i32 = arith.constant 0 : i32
    %c0_i32_0 = arith.constant 0 : i32
    return %arg0, %c0_i32 : i32, i32
  }
  func.func @transform_1(%arg0: i32) -> (i32, i32, i32) {
    %c0_i32 = arith.constant 0 : i32
    %c0_i32_0 = arith.constant 0 : i32
    %c0_i32_1 = arith.constant 0 : i32
    return %arg0, %c0_i32, %c0_i32_0 : i32, i32, i32
  }
  func.func @transform_2(%arg0: i32) -> (i32, i32, i32, i32) {
    %c0_i32 = arith.constant 0 : i32
    %c0_i32_0 = arith.constant 0 : i32
    %c0_i32_1 = arith.constant 0 : i32
    %c0_i32_2 = arith.constant 0 : i32
    return %c0_i32, %arg0, %c0_i32_0, %c0_i32_1 : i32, i32, i32, i32
  }
  func.func @transform_3(%arg0: i32) -> (i32, i32) {
    %c0_i32 = arith.constant 0 : i32
    %c0_i32_0 = arith.constant 0 : i32
    return %arg0, %c0_i32 : i32, i32
  }
  func.func @transform_4(%arg0: i32) -> (i32, i32, i32) {
    %c0_i32 = arith.constant 0 : i32
    %c0_i32_0 = arith.constant 0 : i32
    %c0_i32_1 = arith.constant 0 : i32
    %c0_i32_2 = arith.constant 0 : i32
    return %c0_i32, %c0_i32_0, %c0_i32_1 : i32, i32, i32
  }
  func.func @transform_5(%arg0: i32) -> (i32, i32, i32) {
    %c0_i32 = arith.constant 0 : i32
    %c0_i32_0 = arith.constant 0 : i32
    %c0_i32_1 = arith.constant 0 : i32
    %c0_i32_2 = arith.constant 0 : i32
    return %c0_i32, %c0_i32_0, %c0_i32_1 : i32, i32, i32
  }
  func.func @transform_6(%arg0: i32) -> (i32, i32) {
    %c0_i32 = arith.constant 0 : i32
    %c0_i32_0 = arith.constant 0 : i32
    %c0_i32_1 = arith.constant 0 : i32
    return %c0_i32, %c0_i32_0 : i32, i32
  }
  func.func @transform_7(%arg0: i32) -> (i32, i32) {
    %c0_i32 = arith.constant 0 : i32
    %c0_i32_0 = arith.constant 0 : i32
    %c0_i32_1 = arith.constant 0 : i32
    return %c0_i32, %c0_i32_0 : i32, i32
  }
  func.func @transform_8(%arg0: i32) -> (i32, i32) {
    %c0_i32 = arith.constant 0 : i32
    %c0_i32_0 = arith.constant 0 : i32
    %c0_i32_1 = arith.constant 0 : i32
    return %c0_i32, %c0_i32_0 : i32, i32
  }
  func.func @transform_9(%arg0: i32) -> (i32, i32) {
    %c0_i32 = arith.constant 0 : i32
    %c0_i32_0 = arith.constant 0 : i32
    return %arg0, %c0_i32 : i32, i32
  }
}

</mosaic_0001>

<bundles_post_ra>
// kernel: tpu_custom_call.1
= control target key start
LH: loop header
LB: loop body
LE: loop exit
PB: predicated region body
PF: predicated region fallthrough
CT: control target
= control target key end

     0   :  { %14 = vsyncpa [#allocation4], 0  ;;  %s3720_s0 = inlined_call_operand.vmem [shape: bf16[256,16], index: 0, kind: input, shape index: {}]   ;;  %s3721_s1 = inlined_call_operand.vmem [shape: bf16[2,128,128], index: 1, kind: input, shape index: {}]   ;;  %s3722_s2 = inlined_call_operand.vmem [shape: bf16[2,2,128,128], index: 2, kind: input, shape index: {}]   ;;  %s3723_s3 = inlined_call_operand.vmem [shape: f32[256,1], index: 3, kind: input, shape index: {}]   ;;  %s3724_s4 = inlined_call_operand.hbm [shape: bf16[5,16,16], index: 4, kind: input, shape index: {}]   ;;  %s3725_s5 = inlined_call_operand.vmem [shape: f32[6,1,16], index: 5, kind: input, shape index: {}]   ;;  %s3726_s6 = inlined_call_operand.vmem [shape: f32[16,128], index: 6, kind: input, shape index: {}]   ;;  %s3727_s7 = inlined_call_operand.hbm [shape: f32[16,128], index: 7, kind: input, shape index: {}]   ;;  %s3728_s8 = inlined_call_operand.vmem [shape: f32[1,128], index: 8, kind: input, shape index: {}]   ;;  %s3729_s9 = inlined_call_operand.hbm [shape: f32[32,128], index: 9, kind: output, shape index: {}]  }
   0x1   :  { %15 = vsyncpa [#allocation7], 0 }
   0x2   :  { %16 = vsyncpa [#allocation5], 0 }
   0x3   :  { %18 = vsyncpa [#allocation5 + $0x1], 0  ;;  %s3234_s30 = smov 0   ;;  %s3236_s10 = smov 0  }
   0x4   :  { %s3238_s11 = smov 0   ;;  %s3240_s12 = smov 0  }
   0x5 LB: > { %s3255_s13 = sadd.s32 4294967295, %s3172_s12   ;;  %s2453_s14 = sadd.s32 4294967294, %s3172_s12   ;;  %s3172_s12 = sphi %s3240_s12, %s3747_s12   ;;  %s3168_s11 = sphi %s3238_s11, %s3751_s11   ;;  %s3164_s10 = sphi %s3236_s10, %s3750_s10   ;;  %s3160_s30 = sphi %s3234_s30, %s3749_s30  }
   0x6   : > { %s3259_s15 = sadd.s32 1, %s3172_s12   ;;  %s83_s16 = sadd.s32 1, %s3168_s11 }
   0x7   : > { %3734 = sst [smem:[#allocation12_spill]] %s3259_s15  ;;  %s80_s17 = ssub.s32 %s3172_s12, %s3259_s15 }
   0x8   : > { %p90_p0 = scmp.ne.s32.totalorder %s3168_s11, %s3164_s10  ;;  %p81_p1 = scmp.eq.s32.totalorder %s80_s17, 0 }
   0x9   : > { %p91_p2 = scmp.eq.s32.totalorder %s3172_s12, 0  ;;  %p251_p3 = scmp.eq.s32.totalorder %s3255_s13, 1 }
   0xa   : > { %p256_p4 = scmp.ne.s32.totalorder %s3164_s10, %s3160_s30  ;;  %p257_p7 = scmp.eq.s32.totalorder %s2453_s14, 1 }
   0xb   : > { %s3271_s18 = scalar_select %p81_p1, %s3168_s11, %s83_s16  }
   0xc   : > { %p3273_p5 = por %p91_p2, %p90_p0  ;;  %p3277_p6 = por %p251_p3, %p90_p0 }
   0xd   : > { %3735 = sst [smem:[#allocation13_spill]] %s3271_s18  ;;  %p2454_p8 = scmp.ge.s32.totalorder %s3172_s12, 1 }
   0xe   : > { %s3737_s20 = scalar_select %p3277_p6, 1, 0 }
   0xf   : > { %p264_p9 = scmp.lt.s32.totalorder %s3172_s12, 3  ;;  %p3283_p10 = por %p257_p7, %p256_p4 }
  0x10   : > { %p3730_p11 = scmp.eq.s32.totalorder %s3255_s13, 0  ;;  %s3174_s23 = smov [#allocation3]  }
  0x11   : > { %s3738_s21 = scalar_select %p3283_p10, 1, 0 }
  0x12   : > { %p3288_p12 = pnand %p2454_p8, %p264_p9  ;;  %s276_s24 = sshll.u32 %s3174_s23, 4  ;;  %s277_s24 = int_to_ptr.vmem [resolvable:$true] %s276_s24 }
  0x13   : > { %s3175_s26 = smov [#allocation6]   ;;  %s3063_s28 = scalar_lea.vmem %s277_s24, 640 }
  0x14   : > { %p2956_p13 = pneg %p3288_p12  ;;  %s295_s27 = sshll.u32 %s3175_s26, 4  ;;  %s296_s27 = int_to_ptr.vmem [resolvable:$true] %s295_s27 }
  0x15   : > { %p3064_p2 = scmp.ne.s32.totalorder %s277_s24, %s3063_s28  ;;  %p3071_p7 = scmp.lt.s32.totalorder %s277_s24, %s277_s24 }
  0x16   : > { %p3296_p0 = pnand %p3730_p11, %p2956_p13  ;;  %p3072_p8 = scmp.lt.s32.totalorder %s3063_s28, %s3063_s28 }
  0x18   : > { %p3054_p1 = pneg %p3296_p0  ;;  %p3073_p9 = por %p3072_p8, %p3071_p7 }
  0x1a   : > { %p3066_p3 = pnand %p3064_p2, %p3054_p1 }
  0x1c   : > { %p3067_p4 = pneg %p3066_p3 }
  0x1e   : > { %p3074_p13 = pnand %p3073_p9, %p3067_p4 }
  0x20   : > { %3077 = shalt.err (!%p3074_p13)
}
  0x21   : > { %s3176_s29 = smov 64   ;;  %s3177_s14 = smov 4  }
  0x22   : > { %2959 = dma.hbm_to_vmem [thread:$0]  (!%p3296_p0), %s3724_s4, 640, %s277_s24, [#allocation4], %s3176_s29, %s3176_s29, %s3177_s14  }
  0x23   : > { %s3089_s23 = scalar_lea.vmem %s296_s27, 256  ;;  %p3097_p10 = scmp.lt.s32.totalorder %s296_s27, %s296_s27 }
  0x24   : > { %p3090_p11 = scmp.ne.s32.totalorder %s296_s27, %s3089_s23  ;;  %p3098_p6 = scmp.lt.s32.totalorder %s3089_s23, %s3089_s23 }
  0x26   : > { %p3092_p2 = pnand %p3090_p11, %p3054_p1  ;;  %p3099_p7 = por %p3098_p6, %p3097_p10 }
  0x28   : > { %p3093_p3 = pneg %p3092_p2 }
  0x2a   : > { %p3100_p4 = pnand %p3099_p7, %p3093_p3 }
  0x2c   : > { %3103 = shalt.err (!%p3100_p4)
}
  0x2d   : > { %s3178_s26 = smov 128   ;;  %s3179_s28 = smov 8  }
  0x2e   : > { %2962 = dma.hbm_to_vmem [thread:$0]  (!%p3296_p0), %s3727_s7, 256, %s296_s27, [#allocation7], %s3178_s26, %s3178_s26, %s3179_s28  }
  0x2f   : > { %p2457_p8 = scmp.ge.s32.totalorder %s3172_s12, 2 }
  0x31   : > { %308 = sbr.rel (%p2457_p8) target bundleno = 66 (0x42), region = 36 }
  0x36   : > { %328 = sbr.rel (!%p3273_p5) target bundleno = 66 (0x42), region = 48  ;;  %s330_s24 = sand.u32 (%p3273_p5), 1, %s3168_s11  }
  0x37   : > { %s2584_s29 = sshll.u32 (%p3273_p5), %s3172_s12, 6  ;;  %s2458_s14 = sshll.u32 (%p3273_p5), %s330_s24, 7 }
  0x38   : > { %s3328_s25 = scalar_lea.vmem (%p3273_p5), %s3722_s2, %s2584_s29  ;;  %s332_s15 = scalar_lea.vmem (%p3273_p5), [#allocation2], %s2458_s14 }
  0x39   : > { %v352_v0 = vld [vmem:[%s3328_s25] sm:$0xff] (%p3273_p5)   ;;  %v356_v1 = vld [vmem:[%s3328_s25 + $0x8] sm:$0xff] (%p3273_p5)   ;;  %v360_v2 = vld [vmem:[%s3328_s25 + $0x10] sm:$0xff] (%p3273_p5)  }
  0x3a   : > { %353 = vst [vmem:[%s332_s15] sm:$0xff] (%p3273_p5), %v352_v0   ;;  %357 = vst [vmem:[%s332_s15 + $0x8] sm:$0xff] (%p3273_p5), %v356_v1   ;;  %v364_v3 = vld [vmem:[%s3328_s25 + $0x18] sm:$0xff] (%p3273_p5)   ;;  %v368_v4 = vld [vmem:[%s3328_s25 + $0x20] sm:$0xff] (%p3273_p5)  }
  0x3b   : > { %361 = vst [vmem:[%s332_s15 + $0x10] sm:$0xff] %v360_v2   ;;  %v372_v5 = vld [vmem:[%s3328_s25 + $0x28] sm:$0xff]   ;;  %365 = vst [vmem:[%s332_s15 + $0x18] sm:$0xff] %v364_v3   ;;  %v376_v6 = vld [vmem:[%s3328_s25 + $0x30] sm:$0xff]  }
  0x3c   : > { %369 = vst [vmem:[%s332_s15 + $0x20] sm:$0xff] %v368_v4   ;;  %373 = vst [vmem:[%s332_s15 + $0x28] sm:$0xff] %v372_v5   ;;  %v380_v7 = vld [vmem:[%s3328_s25 + $0x38] sm:$0xff]   ;;  %v384_v8 = vld [vmem:[%s3328_s25 + $0x80] sm:$0xff]  }
  0x3d   : > { %377 = vst [vmem:[%s332_s15 + $0x30] sm:$0xff] %v376_v6   ;;  %381 = vst [vmem:[%s332_s15 + $0x38] sm:$0xff] %v380_v7   ;;  %v388_v9 = vld [vmem:[%s3328_s25 + $0x88] sm:$0xff]   ;;  %v392_v10 = vld [vmem:[%s3328_s25 + $0x90] sm:$0xff]  }
  0x3e   : > { %385 = vst [vmem:[%s332_s15 + $0x40] sm:$0xff] %v384_v8   ;;  %v396_v11 = vld [vmem:[%s3328_s25 + $0x98] sm:$0xff]   ;;  %389 = vst [vmem:[%s332_s15 + $0x48] sm:$0xff] %v388_v9   ;;  %v400_v12 = vld [vmem:[%s3328_s25 + $0xa0] sm:$0xff]  }
  0x3f   : > { %393 = vst [vmem:[%s332_s15 + $0x50] sm:$0xff] %v392_v10   ;;  %397 = vst [vmem:[%s332_s15 + $0x58] sm:$0xff] %v396_v11   ;;  %v404_v13 = vld [vmem:[%s3328_s25 + $0xa8] sm:$0xff]   ;;  %v408_v14 = vld [vmem:[%s3328_s25 + $0xb0] sm:$0xff]  }
  0x40   : > { %401 = vst [vmem:[%s332_s15 + $0x60] sm:$0xff] %v400_v12   ;;  %405 = vst [vmem:[%s332_s15 + $0x68] sm:$0xff] %v404_v13   ;;  %v412_v15 = vld [vmem:[%s3328_s25 + $0xb8] sm:$0xff]  }
  0x41   : > { %409 = vst [vmem:[%s332_s15 + $0x70] sm:$0xff] %v408_v14   ;;  %413 = vst [vmem:[%s332_s15 + $0x78] sm:$0xff] %v412_v15  }
  0x42 PF: > { %515 = sbr.rel (%p3288_p12) target bundleno = 2619 (0xa3b), region = 93  ;;  %s3349_s18 = sand.u32 (!%p3288_p12), 1, %s3164_s10  }
  0x43   : > { %s2462_s19 = sshll.u32 (!%p3288_p12), %s3349_s18, 7  ;;  %p3741_p5 = scmp.eq.s32.totalorder (!%p3288_p12), %s3255_s13, 0 }
  0x44   : > { %s3352_s27 = scalar_lea.vmem (!%p3288_p12), [#allocation2], %s2462_s19 }
  0x47   : > { %3147 = dma.done.wait (%p3741_p5), [#allocation4], 640   ;;  %p3742_p6 = pmov %p3741_p5 }
  0x48   : > { %p3743_p10 = pmov %p3741_p5 }
  0x49   : > { %3149 = vsyncadd (%p3742_p6), [#allocation4], 4294966656 }
  0x4a   : > { %3151 = dma.done.wait (%p3743_p10), [#allocation7], 256   ;;  %p3744_p11 = pmov %p3741_p5 }
  0x4b   : > { %s2466_s22 = sshll.u32 %s3255_s13, 4  ;;  %v3015_v16 = vld [vmem:[#allocation3] sm:$0xff]   ;;  %vm659_vm0 = vcmask 130048   ;;  %p582_p0 = scmp.lt.s32.totalorder %s3255_s13, 1  ;;  %v3040_v58 = vld [vmem:[#allocation3 + $0x8] sm:$0xff]  }
  0x4c   : > { %3153 = vsyncadd (%p3744_p11), [#allocation7], 4294967040  ;;  %p577_p12 = scmp.lt.s32.totalorder %s2466_s22, 31  ;;  %2702 = vmatprep.subr.bf16.mxu0 %v3015_v16  ;;  %v3032_v57 = vld [vmem:[%s3352_s27] sm:$0xff]   ;;  %p3745_p9 = scmp.ne.s32.totalorder %s3737_s20, 0 }
  0x4d   : > { %2703 = vmatpush3.bf16.msra.mxu0 %v3015_v16  ;;  %s583_s29 = scalar_select %p582_p0, %s3255_s13, 1  ;;  %v2489_v9 = vld [vmem:[%s3725_s5] ss:$0 sm:$0xff] }
  0x4e   : > { %s3753_s22 = smov (!%p577_p12, %s2466_s22), 31 }
  0x4f   : > { %s2467_s23 = sshll.u32 %s3753_s22, 2  ;;  %s2585_s14 = sshll.u32 %s583_s29, 6 }
  0x50   : > { %s580_s24 = scalar_lea.vmem %s3720_s0, %s2467_s23  ;;  %s3382_s25 = scalar_lea.vmem %s3721_s1, %s2585_s14 }
  0x51   : > { %v3016_v17 = vld [vmem:[%s580_s24] sm:$0xff]   ;;  %v3017_v18 = vld [vmem:[%s580_s24 + $0x8] sm:$0xff]   ;;  %v3018_v19 = vld [vmem:[%s580_s24 + $0x10] sm:$0xff]   ;;  %s2471_s15 = sshll.u32 %s3753_s22, 3  ;;  %s2465_s29 = sshll.u32 %s3349_s18, 4 }
  0x52   : > { %2704 = vmatprep.mubr.msk.bf16.mxu0 %vm659_vm0, %v3016_v17  ;;  %v3019_v20 = vld [vmem:[%s580_s24 + $0x18] sm:$0xff]   ;;  %v3020_v21 = vld [vmem:[%s580_s24 + $0x20] sm:$0xff]   ;;  %v3021_v22 = vld [vmem:[%s580_s24 + $0x28] sm:$0xff]   ;;  %s3609_s26 = scalar_lea.vmem %s3723_s3, %s2471_s15  ;;  %s575_s17 = scalar_lea.vmem [#allocation8], %s2465_s29 }
  0x53   : > { %2705 = vmatmul.mubr.msk.bf16.vlgmr.msra.gmra.mxu0 %vm659_vm0, %v3017_v18  ;;  %v3022_v23 = vld [vmem:[%s580_s24 + $0x30] sm:$0xff]   ;;  %v3023_v24 = vld [vmem:[%s580_s24 + $0x38] sm:$0xff]   ;;  %v3024_v25 = vld [vmem:[%s3382_s25] sm:$0xff]   ;;  %s2586_s15 = sshll.u32 %s3255_s13, 8  ;;  %s2314_s22 = scalar_lea.sflag [#allocation5], %s3349_s18 }
  0x54   : > { %2708 = vmatprep.mubr.msk.bf16.mxu0 %vm659_vm0, %v3018_v19  ;;  %2736 = vmatprep.mubr.bf16.mxu1 %v3024_v25  ;;  %v3025_v50 = vld [vmem:[%s3382_s25 + $0x8] sm:$0xff]   ;;  %v3026_v51 = vld [vmem:[%s3382_s25 + $0x10] sm:$0xff]   ;;  %v3027_v52 = vld [vmem:[%s3382_s25 + $0x18] sm:$0xff]   ;;  %s3181_s13 = smov [#allocation8]  }
  0x55   : > { %v3028_v53 = vld [vmem:[%s3382_s25 + $0x20] sm:$0xff]   ;;  %v3029_v54 = vld [vmem:[%s3382_s25 + $0x28] sm:$0xff]   ;;  %v3030_v55 = vld [vmem:[%s3382_s25 + $0x30] sm:$0xff]   ;;  %s3108_s24 = sshll.u32 %s3181_s13, 4  ;;  %s3109_s24 = int_to_ptr.vmem [resolvable:$false] %s3108_s24 }
  0x56   : > { %v3031_v56 = vld [vmem:[%s3382_s25 + $0x38] sm:$0xff]   ;;  %s2327_s25 = sshll.u32 %s575_s17, 4  ;;  %s3672_s25 = int_to_ptr.vmem [resolvable:$true] %s2327_s25 }
  0x57   : > { %s3104_s28 = scalar_lea.vmem %s3672_s25, 256  ;;  %p3111_p3 = scmp.lt.s32.totalorder %s3672_s25, %s3109_s24 }
  0x58   : > { %p3105_p1 = scmp.ne.s32.totalorder %s3672_s25, %s3104_s28 }
  0x5a   : > { %p3106_p13 = pnand %p3105_p1, %p3745_p9 }
  0x5b   : > { %2709 = vmatmul.mubr.msk.bf16.gmra.mxu0 %vm659_vm0, %v3019_v20 }
  0x5c   : > { %2712 = vmatprep.mubr.msk.bf16.mxu0 %vm659_vm0, %v3020_v21  ;;  %p3107_p2 = pneg %p3106_p13 }
  0x63   : > { %2713 = vmatmul.mubr.msk.bf16.gmra.mxu0 %vm659_vm0, %v3021_v22 }
  0x64   : > { %2716 = vmatprep.mubr.msk.bf16.mxu0 %vm659_vm0, %v3022_v23 }
  0x6b   : > { %2717 = vmatmul.mubr.msk.bf16.gmra.mxu0 %vm659_vm0, %v3023_v24 }
  0x6c   : > { %2768 = vmatprep.mubr.bf16.mxu0 %v3032_v57 }
 0x113   : > { %v2706_v26 = vpop.f32.mrf.mxu0 }
 0x115   : > { %v718_v27 = vpop.f32.mrf.mxu0 }
 0x117   : > { %v2707_v28 = vpop.f32.mrf.mxu0 }
 0x118   : > { %v798_v48 = vpack.c.bf16 %v2707_v28, %v2706_v26 }
 0x119   : > { %v721_v29 = vpop.f32.mrf.mxu0 }
 0x11a   : > { %v797_v49 = vpack.c.bf16 %v721_v29, %v718_v27 }
 0x11b   : > { %v2710_v30 = vpop.f32.mrf.mxu0 }
 0x11d   : > { %v734_v31 = vpop.f32.mrf.mxu0 }
 0x11f   : > { %v2711_v32 = vpop.f32.mrf.mxu0 }
 0x120   : > { %v800_v46 = vpack.c.bf16 %v2711_v32, %v2710_v30 }
 0x121   : > { %v737_v33 = vpop.f32.mrf.mxu0 }
 0x122   : > { %v799_v47 = vpack.c.bf16 %v737_v33, %v734_v31 }
 0x123   : > { %v2714_v34 = vpop.f32.mrf.mxu0 }
 0x125   : > { %v750_v35 = vpop.f32.mrf.mxu0 }
 0x127   : > { %v2715_v36 = vpop.f32.mrf.mxu0 }
 0x128   : > { %v802_v44 = vpack.c.bf16 %v2715_v36, %v2714_v34  ;;  %v3033_v36 = vld [vmem:[%s3352_s27 + $0x8] sm:$0xff]  }
 0x129   : > { %v753_v37 = vpop.f32.mrf.mxu0 }
 0x12a   : > { %v801_v45 = vpack.c.bf16 %v753_v37, %v750_v35  ;;  %v3034_v37 = vld [vmem:[%s3352_s27 + $0x10] sm:$0xff]  }
 0x12b   : > { %v2718_v38 = vpop.f32.mrf.mxu0 }
 0x12d   : > { %v766_v39 = vpop.f32.mrf.mxu0 }
 0x12f   : > { %v2719_v40 = vpop.f32.mrf.mxu0 }
 0x130   : > { %v804_v41 = vpack.c.bf16 %v2719_v40, %v2718_v38  ;;  %v3035_v38 = vld [vmem:[%s3352_s27 + $0x18] sm:$0xff]   ;;  %v3037_v40 = vld [vmem:[%s3352_s27 + $0x28] sm:$0xff]  }
 0x131   : > { %v769_v42 = vpop.f32.mrf.mxu0 }
 0x132   : > { %v803_v43 = vpack.c.bf16 %v769_v42, %v766_v39  ;;  %2720 = vmatprep.subr.bf16.mxu1 %v804_v41  ;;  %v3036_v39 = vld [vmem:[%s3352_s27 + $0x20] sm:$0xff]   ;;  %v3039_v42 = vld [vmem:[%s3352_s27 + $0x38] sm:$0xff]  }
 0x133   : > { %2721 = vmatpush3.bf16.msra.mxu1 %v804_v41  ;;  %v3038_v41 = vld [vmem:[%s3352_s27 + $0x30] sm:$0xff]  }
 0x134   : > { %2722 = vmatprep.subr.bf16.mxu1 %v803_v43 }
 0x137   : > { %2723 = vmatpush3.bf16.msra.mxu1 %v803_v43  ;;  %v3041_v43 = vld [vmem:[#allocation3 + $0x18] sm:$0xff]  }
 0x138   : > { %2724 = vmatprep.subr.bf16.mxu1 %v802_v44 }
 0x13b   : > { %2725 = vmatpush3.bf16.msra.mxu1 %v802_v44 }
 0x13c   : > { %2726 = vmatprep.subr.bf16.mxu1 %v801_v45 }
 0x13f   : > { %2727 = vmatpush3.bf16.msra.mxu1 %v801_v45 }
 0x140   : > { %2728 = vmatprep.subr.bf16.mxu1 %v800_v46 }
 0x143   : > { %2729 = vmatpush3.bf16.msra.mxu1 %v800_v46 }
 0x144   : > { %2730 = vmatprep.subr.bf16.mxu1 %v799_v47 }
 0x147   : > { %2731 = vmatpush3.bf16.msra.mxu1 %v799_v47 }
 0x148   : > { %2732 = vmatprep.subr.bf16.mxu1 %v798_v48 }
 0x14b   : > { %2733 = vmatpush3.bf16.msra.mxu1 %v798_v48 }
 0x14c   : > { %2734 = vmatprep.subr.bf16.mxu1 %v797_v49 }
 0x14f   : > { %2735 = vmatpush3.bf16.msra.mxu1 %v797_v49 }
 0x150   : > { %2784 = vmatprep.subr.bf16.mxu1 %v3040_v58 }
 0x152   : > { %2737 = vmatmul.mubr.bf16.vlgmr.msra.gmra.mxu1 %v3025_v50 }
 0x153   : > { %2740 = vmatprep.mubr.bf16.mxu1 %v3026_v51  ;;  %2785 = vmatpush3.bf16.msra.mxu1 %v3040_v58 }
 0x15a   : > { %2741 = vmatmul.mubr.bf16.gmra.mxu1 %v3027_v52 }
 0x15b   : > { %2744 = vmatprep.mubr.bf16.mxu1 %v3028_v53 }
 0x162   : > { %2745 = vmatmul.mubr.bf16.gmra.mxu1 %v3029_v54 }
 0x163   : > { %2748 = vmatprep.mubr.bf16.mxu1 %v3030_v55 }
 0x16a   : > { %2749 = vmatmul.mubr.bf16.gmra.mxu1 %v3031_v56 }
 0x212   : > { %v2738_v59 = vpop.f32.mrf.mxu1 }
 0x213   : > { %v903_v31 = vadd.f32 %v2738_v59, %v2489_v9 }
 0x214   : > { %v894_v60 = vpop.f32.mrf.mxu1 }
 0x215   : > { %v895_v34 = vadd.f32 %v2489_v9, %v894_v60 }
 0x216   : > { %v2739_v61 = vpop.f32.mrf.mxu1 }
 0x217   : > { %v906_v29 = vadd.f32 %v2739_v61, %v2489_v9 }
 0x218   : > { %v897_v62 = vpop.f32.mrf.mxu1 }
 0x219   : > { %v974_v32 = vpack.c.bf16 %v906_v29, %v903_v31  ;;  %v898_v33 = vadd.f32 %v2489_v9, %v897_v62 }
 0x21a   : > { %v2742_v63 = vpop.f32.mrf.mxu1 }
 0x21b   : > { %v919_v25 = vadd.f32 %v2742_v63, %v2489_v9  ;;  %v973_v35 = vpack.c.bf16 %v898_v33, %v895_v34 }
 0x21c   : > { %v910_v0 = vpop.f32.mrf.mxu1 }
 0x21d   : > { %v911_v28 = vadd.f32 %v2489_v9, %v910_v0 }
 0x21e   : > { %v2743_v1 = vpop.f32.mrf.mxu1 }
 0x21f   : > { %v922_v23 = vadd.f32 %v2743_v1, %v2489_v9 }
 0x220   : > { %v913_v2 = vpop.f32.mrf.mxu1 }
 0x221   : > { %v976_v26 = vpack.c.bf16 %v922_v23, %v919_v25  ;;  %v914_v27 = vadd.f32 %v2489_v9, %v913_v2 }
 0x222   : > { %v2746_v3 = vpop.f32.mrf.mxu1 }
 0x223   : > { %v935_v19 = vadd.f32 %v2746_v3, %v2489_v9  ;;  %v975_v30 = vpack.c.bf16 %v914_v27, %v911_v28 }
 0x224   : > { %v926_v4 = vpop.f32.mrf.mxu1 }
 0x225   : > { %v927_v22 = vadd.f32 %v2489_v9, %v926_v4 }
 0x226   : > { %v2747_v5 = vpop.f32.mrf.mxu1 }
 0x227   : > { %v938_v17 = vadd.f32 %v2747_v5, %v2489_v9 }
 0x228   : > { %v929_v6 = vpop.f32.mrf.mxu1 }
 0x229   : > { %v978_v20 = vpack.c.bf16 %v938_v17, %v935_v19  ;;  %v930_v21 = vadd.f32 %v2489_v9, %v929_v6  ;;  %v2507_v6 = vld [vmem:[%s3725_s5 + $0x1] ss:$0 sm:$0xff] }
 0x22a   : > { %v2750_v7 = vpop.f32.mrf.mxu1 }
 0x22b   : > { %v951_v11 = vadd.f32 %v2750_v7, %v2489_v9  ;;  %v977_v24 = vpack.c.bf16 %v930_v21, %v927_v22 }
 0x22c   : > { %v942_v8 = vpop.f32.mrf.mxu1 }
 0x22d   : > { %v943_v14 = vadd.f32 %v2489_v9, %v942_v8 }
 0x22e   : > { %v2751_v10 = vpop.f32.mrf.mxu1 }
 0x22f   : > { %v954_v12 = vadd.f32 %v2751_v10, %v2489_v9 }
 0x230   : > { %v945_v13 = vpop.f32.mrf.mxu1 }
 0x231   : > { %v980_v15 = vpack.c.bf16 %v954_v12, %v951_v11  ;;  %v946_v16 = vadd.f32 %v2489_v9, %v945_v13 }
 0x233   : > { %v979_v18 = vpack.c.bf16 %v946_v16, %v943_v14  ;;  %2752 = vmatprep.subr.bf16.mxu0 %v980_v15 }
 0x234   : > { %2753 = vmatpush3.bf16.msra.mxu0 %v980_v15 }
 0x235   : > { %2754 = vmatprep.subr.bf16.mxu0 %v979_v18 }
 0x238   : > { %2755 = vmatpush3.bf16.msra.mxu0 %v979_v18 }
 0x239   : > { %2756 = vmatprep.subr.bf16.mxu0 %v978_v20 }
 0x23c   : > { %2757 = vmatpush3.bf16.msra.mxu0 %v978_v20 }
 0x23d   : > { %2758 = vmatprep.subr.bf16.mxu0 %v977_v24 }
 0x240   : > { %2759 = vmatpush3.bf16.msra.mxu0 %v977_v24 }
 0x241   : > { %2760 = vmatprep.subr.bf16.mxu0 %v976_v26 }
 0x244   : > { %2761 = vmatpush3.bf16.msra.mxu0 %v976_v26 }
 0x245   : > { %2762 = vmatprep.subr.bf16.mxu0 %v975_v30 }
 0x248   : > { %2763 = vmatpush3.bf16.msra.mxu0 %v975_v30 }
 0x249   : > { %2764 = vmatprep.subr.bf16.mxu0 %v974_v32 }
 0x24c   : > { %2765 = vmatpush3.bf16.msra.mxu0 %v974_v32 }
 0x24d   : > { %2766 = vmatprep.subr.bf16.mxu0 %v973_v35 }
 0x250   : > { %2767 = vmatpush3.bf16.msra.mxu0 %v973_v35 }
 0x251   : > { %2802 = vmatprep.subr.bf16.mxu0 %v3041_v43 }
 0x253   : > { %2769 = vmatmul.mubr.bf16.vlgmr.msra.gmra.mxu0 %v3033_v36 }
 0x254   : > { %2772 = vmatprep.mubr.bf16.mxu0 %v3034_v37  ;;  %2803 = vmatpush3.bf16.msra.mxu0 %v3041_v43 }
 0x25b   : > { %2773 = vmatmul.mubr.bf16.gmra.mxu0 %v3035_v38 }
 0x25c   : > { %2776 = vmatprep.mubr.bf16.mxu0 %v3036_v39 }
 0x263   : > { %2777 = vmatmul.mubr.bf16.gmra.mxu0 %v3037_v40 }
 0x264   : > { %2780 = vmatprep.mubr.bf16.mxu0 %v3038_v41 }
 0x26b   : > { %2781 = vmatmul.mubr.bf16.gmra.mxu0 %v3039_v42 }
 0x313   : > { %v2770_v44 = vpop.f32.mrf.mxu0 }
 0x315   : > { %v1063_v45 = vpop.f32.mrf.mxu0 }
 0x317   : > { %v2771_v46 = vpop.f32.mrf.mxu0 }
 0x318   : > { %v1127_v49 = vpack.c.bf16 %v2771_v46, %v2770_v44 }
 0x319   : > { %v1066_v47 = vpop.f32.mrf.mxu0 }
 0x31a   : > { %v1126_v48 = vpack.c.bf16 %v1066_v47, %v1063_v45 }
 0x31b   : > { %v2774_v50 = vpop.f32.mrf.mxu0 }
 0x31c   : > { %2786 = vmatprep.mubr.msk.bf16.mxu1 %vm659_vm0, %v1126_v48 }
 0x31d   : > { %v1079_v51 = vpop.f32.mrf.mxu0  ;;  %2787 = vmatmul.mubr.msk.bf16.vlgmr.msra.gmra.mxu1 %vm659_vm0, %v1127_v49 }
 0x31f   : > { %v2775_v52 = vpop.f32.mrf.mxu0 }
 0x320   : > { %v1129_v55 = vpack.c.bf16 %v2775_v52, %v2774_v50 }
 0x321   : > { %v1082_v53 = vpop.f32.mrf.mxu0 }
 0x322   : > { %v1128_v54 = vpack.c.bf16 %v1082_v53, %v1079_v51 }
 0x323   : > { %v2778_v56 = vpop.f32.mrf.mxu0 }
 0x324   : > { %2790 = vmatprep.mubr.msk.bf16.mxu1 %vm659_vm0, %v1128_v54 }
 0x325   : > { %v1095_v57 = vpop.f32.mrf.mxu0  ;;  %2791 = vmatmul.mubr.msk.bf16.gmra.mxu1 %vm659_vm0, %v1129_v55 }
 0x327   : > { %v2779_v58 = vpop.f32.mrf.mxu0 }
 0x328   : > { %v1131_v61 = vpack.c.bf16 %v2779_v58, %v2778_v56 }
 0x329   : > { %v1098_v59 = vpop.f32.mrf.mxu0 }
 0x32a   : > { %v1130_v60 = vpack.c.bf16 %v1098_v59, %v1095_v57 }
 0x32b   : > { %v2782_v62 = vpop.f32.mrf.mxu0 }
 0x32c   : > { %2794 = vmatprep.mubr.msk.bf16.mxu1 %vm659_vm0, %v1130_v60 }
 0x32d   : > { %v1111_v63 = vpop.f32.mrf.mxu0  ;;  %2795 = vmatmul.mubr.msk.bf16.gmra.mxu1 %vm659_vm0, %v1131_v61  ;;  %v3042_v61 = vld [vmem:[%s3352_s27 + $0x40] sm:$0xff]  }
 0x32f   : > { %v2783_v0 = vpop.f32.mrf.mxu0 }
 0x330   : > { %v1133_v3 = vpack.c.bf16 %v2783_v0, %v2782_v62  ;;  %v3044_v62 = vld [vmem:[%s3352_s27 + $0x50] sm:$0xff]  }
 0x331   : > { %v1114_v1 = vpop.f32.mrf.mxu0 }
 0x332   : > { %v1132_v2 = vpack.c.bf16 %v1114_v1, %v1111_v63 }
 0x334   : > { %2798 = vmatprep.mubr.msk.bf16.mxu1 %vm659_vm0, %v1132_v2 }
 0x335   : > { %2799 = vmatmul.mubr.msk.bf16.gmra.mxu1 %vm659_vm0, %v1133_v3 }
 0x336   : > { %2840 = vmatprep.mubr.bf16.mxu1 %v3044_v62  ;;  %v3050_v62 = vld [vmem:[#allocation3 + $0x10] sm:$0xff]  }
 0x3dd   : > { %v2788_v4 = vpop.f32.mrf.mxu1 }
 0x3de   : > { %v1218_v10 = vadd.f32 %v2788_v4, %v2507_v6 }
 0x3df   : > { %v1209_v5 = vpop.f32.mrf.mxu1 }
 0x3e0   : > { %v1210_v8 = vadd.f32 %v2507_v6, %v1209_v5  ;;  %v1274_v17 = vmax.f32 %v1218_v10, 0.0 }
 0x3e1   : > { %v2789_v7 = vpop.f32.mrf.mxu1 }
 0x3e2   : > { %v1221_v9 = vadd.f32 %v2789_v7, %v2507_v6  ;;  %v1272_v15 = vmax.f32 %v1210_v8, 0.0 }
 0x3e3   : > { %v1212_v11 = vpop.f32.mrf.mxu1 }
 0x3e4   : > { %v1213_v12 = vadd.f32 %v2507_v6, %v1212_v11  ;;  %v1275_v13 = vmax.f32 %v1221_v9, 0.0 }
 0x3e5   : > { %v2792_v14 = vpop.f32.mrf.mxu1 }
 0x3e6   : > { %v1273_v16 = vmax.f32 %v1213_v12, 0.0  ;;  %v1289_v20 = vpack.c.bf16 %v1275_v13, %v1274_v17  ;;  %v1234_v24 = vadd.f32 %v2792_v14, %v2507_v6  ;;  %v2518_v12 = vld [vmem:[%s3725_s5 + $0x3] ss:$0 sm:$0xff] }
 0x3e7   : > { %v1225_v18 = vpop.f32.mrf.mxu1 }
 0x3e8   : > { %v1288_v19 = vpack.c.bf16 %v1273_v16, %v1272_v15  ;;  %v1226_v22 = vadd.f32 %v2507_v6, %v1225_v18  ;;  %v1278_v31 = vmax.f32 %v1234_v24, 0.0 }
 0x3e9   : > { %v2793_v21 = vpop.f32.mrf.mxu1 }
 0x3ea   : > { %v1237_v23 = vadd.f32 %v2793_v21, %v2507_v6  ;;  %2804 = vmatprep.mubr.msk.bf16.mxu0 %vm659_vm0, %v1288_v19  ;;  %v1276_v29 = vmax.f32 %v1226_v22, 0.0 }
 0x3eb   : > { %v1228_v25 = vpop.f32.mrf.mxu1  ;;  %2805 = vmatmul.mubr.msk.bf16.vlgmr.msra.gmra.mxu0 %vm659_vm0, %v1289_v20 }
 0x3ec   : > { %v1229_v26 = vadd.f32 %v2507_v6, %v1228_v25  ;;  %v1279_v27 = vmax.f32 %v1237_v23, 0.0 }
 0x3ed   : > { %v2796_v28 = vpop.f32.mrf.mxu1 }
 0x3ee   : > { %v1277_v30 = vmax.f32 %v1229_v26, 0.0  ;;  %v1291_v34 = vpack.c.bf16 %v1279_v27, %v1278_v31  ;;  %v1250_v38 = vadd.f32 %v2796_v28, %v2507_v6 }
 0x3ef   : > { %v1241_v32 = vpop.f32.mrf.mxu1 }
 0x3f0   : > { %v1290_v33 = vpack.c.bf16 %v1277_v30, %v1276_v29  ;;  %v1242_v36 = vadd.f32 %v2507_v6, %v1241_v32  ;;  %v1282_v45 = vmax.f32 %v1250_v38, 0.0 }
 0x3f1   : > { %v2797_v35 = vpop.f32.mrf.mxu1 }
 0x3f2   : > { %v1253_v37 = vadd.f32 %v2797_v35, %v2507_v6  ;;  %2808 = vmatprep.mubr.msk.bf16.mxu0 %vm659_vm0, %v1290_v33  ;;  %v1280_v43 = vmax.f32 %v1242_v36, 0.0 }
 0x3f3   : > { %v1244_v39 = vpop.f32.mrf.mxu1  ;;  %2809 = vmatmul.mubr.msk.bf16.gmra.mxu0 %vm659_vm0, %v1291_v34 }
 0x3f4   : > { %v1245_v40 = vadd.f32 %v2507_v6, %v1244_v39  ;;  %v1283_v41 = vmax.f32 %v1253_v37, 0.0 }
 0x3f5   : > { %v2800_v42 = vpop.f32.mrf.mxu1 }
 0x3f6   : > { %v1281_v44 = vmax.f32 %v1245_v40, 0.0  ;;  %v1293_v48 = vpack.c.bf16 %v1283_v41, %v1282_v45  ;;  %v1266_v52 = vadd.f32 %v2800_v42, %v2507_v6 }
 0x3f7   : > { %v1257_v46 = vpop.f32.mrf.mxu1 }
 0x3f8   : > { %v1292_v47 = vpack.c.bf16 %v1281_v44, %v1280_v43  ;;  %v1258_v50 = vadd.f32 %v2507_v6, %v1257_v46  ;;  %v1286_v58 = vmax.f32 %v1266_v52, 0.0 }
 0x3f9   : > { %v2801_v49 = vpop.f32.mrf.mxu1 }
 0x3fa   : > { %v1269_v51 = vadd.f32 %v2801_v49, %v2507_v6  ;;  %2812 = vmatprep.mubr.msk.bf16.mxu0 %vm659_vm0, %v1292_v47  ;;  %v1284_v56 = vmax.f32 %v1258_v50, 0.0 }
 0x3fb   : > { %v1260_v53 = vpop.f32.mrf.mxu1  ;;  %2813 = vmatmul.mubr.msk.bf16.gmra.mxu0 %vm659_vm0, %v1293_v48 }
 0x3fc   : > { %v1261_v54 = vadd.f32 %v2507_v6, %v1260_v53  ;;  %v1287_v55 = vmax.f32 %v1269_v51, 0.0 }
 0x3fe   : > { %v1285_v57 = vmax.f32 %v1261_v54, 0.0  ;;  %v1295_v60 = vpack.c.bf16 %v1287_v55, %v1286_v58  ;;  %v3046_v58 = vld [vmem:[%s3352_s27 + $0x60] sm:$0xff]  }
 0x400   : > { %v1294_v59 = vpack.c.bf16 %v1285_v57, %v1284_v56  ;;  %v3043_v56 = vld [vmem:[%s3352_s27 + $0x48] sm:$0xff]   ;;  %v3045_v57 = vld [vmem:[%s3352_s27 + $0x58] sm:$0xff]  }
 0x402   : > { %2816 = vmatprep.mubr.msk.bf16.mxu0 %vm659_vm0, %v1294_v59  ;;  %v3047_v59 = vld [vmem:[%s3352_s27 + $0x68] sm:$0xff]  }
 0x403   : > { %2817 = vmatmul.mubr.msk.bf16.gmra.mxu0 %vm659_vm0, %v1295_v60  ;;  %v3048_v60 = vld [vmem:[%s3352_s27 + $0x70] sm:$0xff]  }
 0x404   : > { %2836 = vmatprep.mubr.bf16.mxu0 %v3042_v61  ;;  %v3049_v61 = vld [vmem:[%s3352_s27 + $0x78] sm:$0xff]   ;;  %s3110_s27 = scalar_lea.vmem %s3109_s24, 512 }
 0x405   : > { %p3112_p7 = scmp.lt.s32.totalorder %s3110_s27, %s3104_s28 }
 0x407   : > { %p3113_p4 = por %p3112_p7, %p3111_p3 }
 0x409   : > { %p3114_p5 = pnand %p3113_p4, %p3107_p2 }
 0x4ab   : > { %v2806_v63 = vpop.f32.mrf.mxu0 }
 0x4ac   : > { %v1380_v45 = vadd.f32 %v2806_v63, %v2518_v12  ;;  %v3051_v63 = vld [vmem:[#allocation3 + $0x20] sm:$0xff]  }
 0x4ad   : > { %v3424_v0 = vpop.f32.mrf.mxu0 }
 0x4ae   : > { %v1436_v50 = vmax.f32 %v1380_v45, 0.0  ;;  %v1372_v51 = vadd.f32 %v2518_v12, %v3424_v0 }
 0x4af   : > { %v2807_v1 = vpop.f32.mrf.mxu0 }
 0x4b0   : > { %v1383_v42 = vadd.f32 %v2807_v1, %v2518_v12  ;;  %v1434_v54 = vmax.f32 %v1372_v51, 0.0 }
 0x4b1   : > { %v3426_v2 = vpop.f32.mrf.mxu0 }
 0x4b2   : > { %v1437_v47 = vmax.f32 %v1383_v42, 0.0  ;;  %v1375_v48 = vadd.f32 %v2518_v12, %v3426_v2 }
 0x4b3   : > { %v2810_v3 = vpop.f32.mrf.mxu0 }
 0x4b4   : > { %v1396_v35 = vadd.f32 %v2810_v3, %v2518_v12  ;;  %v1468_v52 = vpack.c.bf16 %v1437_v47, %v1436_v50  ;;  %v1435_v53 = vmax.f32 %v1375_v48, 0.0 }
 0x4b5   : > { %v1387_v4 = vpop.f32.mrf.mxu0 }
 0x4b6   : > { %v1440_v40 = vmax.f32 %v1396_v35, 0.0  ;;  %v1388_v41 = vadd.f32 %v2518_v12, %v1387_v4  ;;  %v1467_v55 = vpack.c.bf16 %v1435_v53, %v1434_v54 }
 0x4b7   : > { %v2811_v5 = vpop.f32.mrf.mxu0 }
 0x4b8   : > { %v1399_v32 = vadd.f32 %v2811_v5, %v2518_v12  ;;  %v1438_v46 = vmax.f32 %v1388_v41, 0.0 }
 0x4b9   : > { %v1390_v6 = vpop.f32.mrf.mxu0 }
 0x4ba   : > { %v1441_v37 = vmax.f32 %v1399_v32, 0.0  ;;  %v1391_v38 = vadd.f32 %v2518_v12, %v1390_v6 }
 0x4bb   : > { %v2814_v7 = vpop.f32.mrf.mxu0 }
 0x4bc   : > { %v1412_v23 = vadd.f32 %v2814_v7, %v2518_v12  ;;  %v1470_v43 = vpack.c.bf16 %v1441_v37, %v1440_v40  ;;  %v1439_v44 = vmax.f32 %v1391_v38, 0.0 }
 0x4bd   : > { %v1403_v8 = vpop.f32.mrf.mxu0 }
 0x4be   : > { %v1444_v30 = vmax.f32 %v1412_v23, 0.0  ;;  %v1404_v31 = vadd.f32 %v2518_v12, %v1403_v8  ;;  %v1469_v49 = vpack.c.bf16 %v1439_v44, %v1438_v46 }
 0x4bf   : > { %v2815_v9 = vpop.f32.mrf.mxu0 }
 0x4c0   : > { %v1415_v19 = vadd.f32 %v2815_v9, %v2518_v12  ;;  %v1442_v36 = vmax.f32 %v1404_v31, 0.0 }
 0x4c1   : > { %v1406_v10 = vpop.f32.mrf.mxu0 }
 0x4c2   : > { %v1445_v27 = vmax.f32 %v1415_v19, 0.0  ;;  %v1407_v28 = vadd.f32 %v2518_v12, %v1406_v10 }
 0x4c3   : > { %v2818_v11 = vpop.f32.mrf.mxu0 }
 0x4c4   : > { %v1428_v14 = vadd.f32 %v2818_v11, %v2518_v12  ;;  %v1472_v33 = vpack.c.bf16 %v1445_v27, %v1444_v30  ;;  %v1443_v34 = vmax.f32 %v1407_v28, 0.0 }
 0x4c5   : > { %v1419_v13 = vpop.f32.mrf.mxu0 }
 0x4c6   : > { %v1420_v16 = vadd.f32 %v2518_v12, %v1419_v13  ;;  %v1448_v20 = vmax.f32 %v1428_v14, 0.0  ;;  %v1471_v39 = vpack.c.bf16 %v1443_v34, %v1442_v36 }
 0x4c7   : > { %v2819_v15 = vpop.f32.mrf.mxu0 }
 0x4c8   : > { %v1431_v17 = vadd.f32 %v2819_v15, %v2518_v12  ;;  %v1446_v24 = vmax.f32 %v1420_v16, 0.0 }
 0x4c9   : > { %v1422_v18 = vpop.f32.mrf.mxu0 }
 0x4ca   : > { %v1449_v21 = vmax.f32 %v1431_v17, 0.0  ;;  %v1423_v22 = vadd.f32 %v2518_v12, %v1422_v18 }
 0x4cc   : > { %v1474_v25 = vpack.c.bf16 %v1449_v21, %v1448_v20  ;;  %v1447_v26 = vmax.f32 %v1423_v22, 0.0 }
 0x4ce   : > { %v1473_v29 = vpack.c.bf16 %v1447_v26, %v1446_v24  ;;  %2820 = vmatprep.subr.bf16.mxu0 %v1474_v25  ;;  %2930 = vmatprep.subr.bf16.mxu1 %v1474_v25  ;;  %v2553_v26 = vld [vmem:[%s3725_s5 + $0x2] ss:$0 sm:$0xff] }
 0x4cf   : > { %2821 = vmatpush3.bf16.msra.mxu0 %v1474_v25  ;;  %2938 = vmatpush3.bf16.msra.mxu1 %v1474_v25 }
 0x4d0   : > { %2822 = vmatprep.subr.bf16.mxu0 %v1473_v29  ;;  %2931 = vmatprep.subr.bf16.mxu1 %v1473_v29 }
 0x4d3   : > { %2823 = vmatpush3.bf16.msra.mxu0 %v1473_v29  ;;  %2939 = vmatpush3.bf16.msra.mxu1 %v1473_v29 }
 0x4d4   : > { %2824 = vmatprep.subr.bf16.mxu0 %v1472_v33  ;;  %2932 = vmatprep.subr.bf16.mxu1 %v1472_v33 }
 0x4d7   : > { %2825 = vmatpush3.bf16.msra.mxu0 %v1472_v33  ;;  %2940 = vmatpush3.bf16.msra.mxu1 %v1472_v33 }
 0x4d8   : > { %2826 = vmatprep.subr.bf16.mxu0 %v1471_v39  ;;  %2933 = vmatprep.subr.bf16.mxu1 %v1471_v39 }
 0x4db   : > { %2827 = vmatpush3.bf16.msra.mxu0 %v1471_v39  ;;  %2941 = vmatpush3.bf16.msra.mxu1 %v1471_v39 }
 0x4dc   : > { %2828 = vmatprep.subr.bf16.mxu0 %v1470_v43  ;;  %2934 = vmatprep.subr.bf16.mxu1 %v1470_v43 }
 0x4df   : > { %2829 = vmatpush3.bf16.msra.mxu0 %v1470_v43  ;;  %2942 = vmatpush3.bf16.msra.mxu1 %v1470_v43 }
 0x4e0   : > { %2830 = vmatprep.subr.bf16.mxu0 %v1469_v49  ;;  %2935 = vmatprep.subr.bf16.mxu1 %v1469_v49 }
 0x4e3   : > { %2831 = vmatpush3.bf16.msra.mxu0 %v1469_v49  ;;  %2943 = vmatpush3.bf16.msra.mxu1 %v1469_v49 }
 0x4e4   : > { %2832 = vmatprep.subr.bf16.mxu0 %v1468_v52  ;;  %2936 = vmatprep.subr.bf16.mxu1 %v1468_v52 }
 0x4e7   : > { %2833 = vmatpush3.bf16.msra.mxu0 %v1468_v52  ;;  %2944 = vmatpush3.bf16.msra.mxu1 %v1468_v52 }
 0x4e8   : > { %2834 = vmatprep.subr.bf16.mxu0 %v1467_v55  ;;  %2937 = vmatprep.subr.bf16.mxu1 %v1467_v55 }
 0x4eb   : > { %2835 = vmatpush3.bf16.msra.mxu0 %v1467_v55  ;;  %2945 = vmatpush3.bf16.msra.mxu1 %v1467_v55 }
 0x4ec   : > { %2852 = vmatprep.subr.bf16.mxu0 %v3050_v62  ;;  %2870 = vmatprep.subr.bf16.mxu1 %v3051_v63 }
 0x4ee   : > { %2837 = vmatmul.mubr.bf16.vlgmr.msra.gmra.mxu0 %v3043_v56  ;;  %2841 = vmatmul.mubr.bf16.vlgmr.msra.gmra.mxu1 %v3045_v57 }
 0x4ef   : > { %2844 = vmatprep.mubr.bf16.mxu1 %v3046_v58  ;;  %2853 = vmatpush3.bf16.msra.mxu0 %v3050_v62 }
 0x4f0   : > { %2871 = vmatpush3.bf16.msra.mxu1 %v3051_v63 }
 0x4f6   : > { %2845 = vmatmul.mubr.bf16.gmra.mxu1 %v3047_v59 }
 0x4f7   : > { %2848 = vmatprep.mubr.bf16.mxu1 %v3048_v60 }
 0x4fe   : > { %2849 = vmatmul.mubr.bf16.gmra.mxu1 %v3049_v61 }
 0x5ae   : > { %v2838_v0 = vpop.f32.mrf.mxu0  ;;  %v2842_v1 = vpop.f32.mrf.mxu1 }
 0x5b0   : > { %v1557_v2 = vpop.f32.mrf.mxu0  ;;  %v1573_v3 = vpop.f32.mrf.mxu1 }
 0x5b2   : > { %v2839_v4 = vpop.f32.mrf.mxu0  ;;  %v2843_v5 = vpop.f32.mrf.mxu1 }
 0x5b3   : > { %v1621_v10 = vpack.c.bf16 %v2839_v4, %v2838_v0  ;;  %v1623_v16 = vpack.c.bf16 %v2843_v5, %v2842_v1 }
 0x5b4   : > { %v1560_v6 = vpop.f32.mrf.mxu0  ;;  %v1576_v7 = vpop.f32.mrf.mxu1 }
 0x5b5   : > { %v1620_v8 = vpack.c.bf16 %v1560_v6, %v1557_v2  ;;  %v1622_v9 = vpack.c.bf16 %v1576_v7, %v1573_v3 }
 0x5b6   : > { %v2846_v11 = vpop.f32.mrf.mxu1 }
 0x5b7   : > { %2854 = vmatprep.mubr.msk.bf16.mxu0 %vm659_vm0, %v1620_v8 }
 0x5b8   : > { %2855 = vmatmul.mubr.msk.bf16.vlgmr.msra.gmra.mxu0 %vm659_vm0, %v1621_v10  ;;  %v1589_v12 = vpop.f32.mrf.mxu1 }
 0x5b9   : > { %2858 = vmatprep.mubr.msk.bf16.mxu0 %vm659_vm0, %v1622_v9 }
 0x5ba   : > { %v2847_v13 = vpop.f32.mrf.mxu1 }
 0x5bb   : > { %v1625_v22 = vpack.c.bf16 %v2847_v13, %v2846_v11 }
 0x5bc   : > { %v1592_v14 = vpop.f32.mrf.mxu1 }
 0x5bd   : > { %v1624_v15 = vpack.c.bf16 %v1592_v14, %v1589_v12 }
 0x5be   : > { %v2850_v17 = vpop.f32.mrf.mxu1 }
 0x5c0   : > { %2859 = vmatmul.mubr.msk.bf16.gmra.mxu0 %vm659_vm0, %v1623_v16  ;;  %v1605_v18 = vpop.f32.mrf.mxu1 }
 0x5c1   : > { %2862 = vmatprep.mubr.msk.bf16.mxu0 %vm659_vm0, %v1624_v15 }
 0x5c2   : > { %v2851_v19 = vpop.f32.mrf.mxu1 }
 0x5c3   : > { %v1627_v23 = vpack.c.bf16 %v2851_v19, %v2850_v17 }
 0x5c4   : > { %v1608_v20 = vpop.f32.mrf.mxu1 }
 0x5c5   : > { %v1626_v21 = vpack.c.bf16 %v1608_v20, %v1605_v18 }
 0x5c8   : > { %2863 = vmatmul.mubr.msk.bf16.gmra.mxu0 %vm659_vm0, %v1625_v22 }
 0x5c9   : > { %2866 = vmatprep.mubr.msk.bf16.mxu0 %vm659_vm0, %v1626_v21 }
 0x5d0   : > { %2867 = vmatmul.mubr.msk.bf16.gmra.mxu0 %vm659_vm0, %v1627_v23 }
 0x678   : > { %v2856_v24 = vpop.f32.mrf.mxu0 }
 0x679   : > { %v1712_v30 = vadd.f32 %v2856_v24, %v2553_v26 }
 0x67a   : > { %v1703_v25 = vpop.f32.mrf.mxu0 }
 0x67b   : > { %v1704_v28 = vadd.f32 %v2553_v26, %v1703_v25  ;;  %v1768_v37 = vmax.f32 %v1712_v30, 0.0 }
 0x67c   : > { %v2857_v27 = vpop.f32.mrf.mxu0 }
 0x67d   : > { %v1715_v29 = vadd.f32 %v2857_v27, %v2553_v26  ;;  %v1766_v35 = vmax.f32 %v1704_v28, 0.0 }
 0x67e   : > { %v1706_v31 = vpop.f32.mrf.mxu0 }
 0x67f   : > { %v1707_v32 = vadd.f32 %v2553_v26, %v1706_v31  ;;  %v1769_v33 = vmax.f32 %v1715_v29, 0.0  ;;  %v3467_v29 = vld [vmem:[%s3725_s5 + $0x4] ss:$0 sm:$0xff] }
 0x680   : > { %v2860_v34 = vpop.f32.mrf.mxu0 }
 0x681   : > { %v1767_v36 = vmax.f32 %v1707_v32, 0.0  ;;  %v1783_v40 = vpack.c.bf16 %v1769_v33, %v1768_v37  ;;  %v1728_v44 = vadd.f32 %v2860_v34, %v2553_v26 }
 0x682   : > { %v1719_v38 = vpop.f32.mrf.mxu0 }
 0x683   : > { %v1782_v39 = vpack.c.bf16 %v1767_v36, %v1766_v35  ;;  %v1720_v42 = vadd.f32 %v2553_v26, %v1719_v38  ;;  %v1772_v51 = vmax.f32 %v1728_v44, 0.0 }
 0x684   : > { %v2861_v41 = vpop.f32.mrf.mxu0 }
 0x685   : > { %v1731_v43 = vadd.f32 %v2861_v41, %v2553_v26  ;;  %2872 = vmatprep.mubr.msk.bf16.mxu1 %vm659_vm0, %v1782_v39  ;;  %v1770_v49 = vmax.f32 %v1720_v42, 0.0  ;;  %v3489_v41 = vld [vmem:[%s3725_s5 + $0x5] ss:$0 sm:$0xff] }
 0x686   : > { %v1722_v45 = vpop.f32.mrf.mxu0  ;;  %2873 = vmatmul.mubr.msk.bf16.vlgmr.msra.gmra.mxu1 %vm659_vm0, %v1783_v40 }
 0x687   : > { %v1723_v46 = vadd.f32 %v2553_v26, %v1722_v45  ;;  %v1773_v47 = vmax.f32 %v1731_v43, 0.0 }
 0x688   : > { %v2864_v48 = vpop.f32.mrf.mxu0 }
 0x689   : > { %v1771_v50 = vmax.f32 %v1723_v46, 0.0  ;;  %v1785_v54 = vpack.c.bf16 %v1773_v47, %v1772_v51  ;;  %v1744_v58 = vadd.f32 %v2864_v48, %v2553_v26 }
 0x68a   : > { %v1735_v52 = vpop.f32.mrf.mxu0 }
 0x68b   : > { %v1784_v53 = vpack.c.bf16 %v1771_v50, %v1770_v49  ;;  %v1736_v56 = vadd.f32 %v2553_v26, %v1735_v52  ;;  %v1776_v1 = vmax.f32 %v1744_v58, 0.0 }
 0x68c   : > { %v2865_v55 = vpop.f32.mrf.mxu0 }
 0x68d   : > { %v1747_v57 = vadd.f32 %v2865_v55, %v2553_v26  ;;  %2876 = vmatprep.mubr.msk.bf16.mxu1 %vm659_vm0, %v1784_v53  ;;  %v1774_v63 = vmax.f32 %v1736_v56, 0.0 }
 0x68e   : > { %v1738_v59 = vpop.f32.mrf.mxu0  ;;  %2877 = vmatmul.mubr.msk.bf16.gmra.mxu1 %vm659_vm0, %v1785_v54 }
 0x68f   : > { %v1739_v60 = vadd.f32 %v2553_v26, %v1738_v59  ;;  %v1777_v61 = vmax.f32 %v1747_v57, 0.0 }
 0x690   : > { %v2868_v62 = vpop.f32.mrf.mxu0 }
 0x691   : > { %v1775_v0 = vmax.f32 %v1739_v60, 0.0  ;;  %v1787_v4 = vpack.c.bf16 %v1777_v61, %v1776_v1  ;;  %v1760_v8 = vadd.f32 %v2868_v62, %v2553_v26 }
 0x692   : > { %v1751_v2 = vpop.f32.mrf.mxu0 }
 0x693   : > { %v1786_v3 = vpack.c.bf16 %v1775_v0, %v1774_v63  ;;  %v1752_v6 = vadd.f32 %v2553_v26, %v1751_v2  ;;  %v1780_v14 = vmax.f32 %v1760_v8, 0.0 }
 0x694   : > { %v2869_v5 = vpop.f32.mrf.mxu0 }
 0x695   : > { %v1763_v7 = vadd.f32 %v2869_v5, %v2553_v26  ;;  %2880 = vmatprep.mubr.msk.bf16.mxu1 %vm659_vm0, %v1786_v3  ;;  %v1778_v12 = vmax.f32 %v1752_v6, 0.0 }
 0x696   : > { %v1754_v9 = vpop.f32.mrf.mxu0  ;;  %2881 = vmatmul.mubr.msk.bf16.gmra.mxu1 %vm659_vm0, %v1787_v4 }
 0x697   : > { %v1755_v10 = vadd.f32 %v2553_v26, %v1754_v9  ;;  %v1781_v11 = vmax.f32 %v1763_v7, 0.0 }
 0x699   : > { %v1779_v13 = vmax.f32 %v1755_v10, 0.0  ;;  %v1789_v16 = vpack.c.bf16 %v1781_v11, %v1780_v14 }
 0x69b   : > { %v1788_v15 = vpack.c.bf16 %v1779_v13, %v1778_v12 }
 0x69d   : > { %2884 = vmatprep.mubr.msk.bf16.mxu1 %vm659_vm0, %v1788_v15  ;;  %v3180_v15 = vmov 0  }
 0x69e   : > { %2885 = vmatmul.mubr.msk.bf16.gmra.mxu1 %vm659_vm0, %v1789_v16  ;;  %3013 = vset.pattern.permute.xlu0 %v3180_v15 }
 0x69f   : > { %3014 = vset.pattern.permute.xlu1 %v3180_v15 }
 0x746   : > { %v2874_v17 = vpop.f32.mrf.mxu1 }
 0x747   : > { %v3551_v7 = vadd.f32 %v2874_v17, %v3467_v29 }
 0x748   : > { %v3458_v18 = vpop.f32.mrf.mxu1 }
 0x749   : > { %v1930_v16 = vmax.f32 %v3551_v7, 0.0  ;;  %v3570_v17 = vadd.f32 %v3467_v29, %v3458_v18  ;;  %v2222_v7 = vld [vmem:[#allocation6 + $0x8] sm:$0xff] }
 0x74a   : > { %v3460_v19 = vpop.f32.mrf.mxu1 }
 0x74b   : > { %v3560_v11 = vadd.f32 %v3460_v19, %v3467_v29 }
 0x74c   : > { %v3462_v20 = vpop.f32.mrf.mxu1 }
 0x74e   : > { %v2878_v21 = vpop.f32.mrf.mxu1 }
 0x74f   : > { %v3519_v55 = vadd.f32 %v2878_v21, %v3467_v29 }
 0x750   : > { %v1881_v22 = vpop.f32.mrf.mxu1 }
 0x751   : > { %v1934_v63 = vmax.f32 %v3519_v55, 0.0  ;;  %v3536_v0 = vadd.f32 %v3467_v29, %v1881_v22  ;;  %v1931_v22 = vmax.f32 %v3560_v11, 0.0 }
 0x752   : > { %v2879_v23 = vpop.f32.mrf.mxu1 }
 0x753   : > { %v3527_v59 = vadd.f32 %v2879_v23, %v3467_v29  ;;  %v1932_v8 = vmax.f32 %v3536_v0, 0.0  ;;  %v1958_v10 = vmul.f32 %v3489_v41, %v1934_v63  ;;  %v3579_v23 = vadd.f32 %v3467_v29, %v3462_v20 }
 0x754   : > { %v1884_v24 = vpop.f32.mrf.mxu1 }
 0x755   : > { %v1935_v3 = vmax.f32 %v3527_v59, 0.0  ;;  %v3544_v4 = vadd.f32 %v3467_v29, %v1884_v24  ;;  %v1986_v19 = vsel %vm659_vm0, %v1958_v10, 0.0  ;;  %v1956_v21 = vmul.f32 %v3489_v41, %v1932_v8  ;;  %v2022_v10 = vld [vmem:[%s3609_s26 + $0x30] sm:$0xff] }
 0x756   : > { %v2882_v25 = vpop.f32.mrf.mxu1  ;;  %v1929_v20 = vmax.f32 %v3579_v23, 0.0 }
 0x757   : > { %v3470_v31 = vadd.f32 %v2882_v25, %v3467_v29  ;;  %v1933_v12 = vmax.f32 %v3544_v4, 0.0  ;;  %v1959_v14 = vmul.f32 %v3489_v41, %v1935_v3  ;;  %v1928_v25 = vmax.f32 %v3570_v17, 0.0  ;;  %v2049_v4 = vld [vmem:[%s3726_s6 + $0x8] sm:$0xff] }
 0x758   : > { %v1897_v26 = vpop.f32.mrf.mxu1 }
 0x759   : > { %v1938_v36 = vmax.f32 %v3470_v31, 0.0  ;;  %v3500_v46 = vadd.f32 %v3467_v29, %v1897_v26  ;;  %v1989_v24 = vsel %vm659_vm0, %v1959_v14, 0.0  ;;  %v1957_v18 = vmul.f32 %v3489_v41, %v1933_v12  ;;  %v2026_v14 = vld [vmem:[%s3609_s26 + $0x50] sm:$0xff] }
 0x75a   : > { %v2883_v27 = vpop.f32.mrf.mxu1  ;;  %v1980_v26 = vsel %vm659_vm0, %v1956_v21, 0.0  ;;  %v2020_v21 = vld [vmem:[%s3609_s26 + $0x20] sm:$0xff] }
 0x75b   : > { %v3484_v39 = vadd.f32 %v2883_v27, %v3467_v29  ;;  %v1962_v50 = vmul.f32 %v3489_v41, %v1938_v36  ;;  %v1936_v56 = vmax.f32 %v3500_v46, 0.0  ;;  %v1954_v27 = vmul.f32 %v3489_v41, %v1930_v16 }
 0x75c   : > { %v1900_v28 = vpop.f32.mrf.mxu1 }
 0x75d   : > { %v1939_v51 = vmax.f32 %v3484_v39, 0.0  ;;  %v3512_v52 = vadd.f32 %v3467_v29, %v1900_v28  ;;  %v1998_v57 = vsel %vm659_vm0, %v1962_v50, 0.0  ;;  %v1960_v2 = vmul.f32 %v3489_v41, %v1936_v56  ;;  %v2031_v50 = vld [vmem:[%s3609_s26 + $0x78] sm:$0xff] }
 0x75e   : > { %v2886_v30 = vpop.f32.mrf.mxu1  ;;  %v1983_v28 = vsel %vm659_vm0, %v1957_v18, 0.0  ;;  %v2029_v18 = vld [vmem:[%s3609_s26 + $0x68] sm:$0xff] }
 0x75f   : > { %v3473_v33 = vadd.f32 %v2886_v30, %v3467_v29  ;;  %v1937_v60 = vmax.f32 %v3512_v52, 0.0  ;;  %v1963_v62 = vmul.f32 %v3489_v41, %v1939_v51  ;;  %v1992_v9 = vsel %vm659_vm0, %v1960_v2, 0.0 }
 0x760   : > { %v1913_v32 = vpop.f32.mrf.mxu1  ;;  %v1974_v30 = vsel %vm659_vm0, %v1954_v27, 0.0 }
 0x761   : > { %v3476_v34 = vadd.f32 %v3467_v29, %v1913_v32  ;;  %v1942_v42 = vmax.f32 %v3473_v33, 0.0  ;;  %v2001_v5 = vsel %vm659_vm0, %v1963_v62, 0.0  ;;  %v1961_v6 = vmul.f32 %v3489_v41, %v1937_v60  ;;  %v2028_v62 = vld [vmem:[%s3609_s26 + $0x60] sm:$0xff] }
 0x762   : > { %v2887_v35 = vpop.f32.mrf.mxu1  ;;  %v1952_v32 = vmul.f32 %v3489_v41, %v1928_v25 }
 0x763   : > { %v1940_v37 = vmax.f32 %v3476_v34, 0.0  ;;  %v3481_v38 = vadd.f32 %v2887_v35, %v3467_v29  ;;  %v1966_v54 = vmul.f32 %v3489_v41, %v1942_v42  ;;  %v1995_v13 = vsel %vm659_vm0, %v1961_v6, 0.0 }
 0x764   : > { %v1916_v40 = vpop.f32.mrf.mxu1 }
 0x765   : > { %v1943_v43 = vmax.f32 %v3481_v38, 0.0  ;;  %v3494_v44 = vadd.f32 %v3467_v29, %v1916_v40  ;;  %v1964_v45 = vmul.f32 %v3489_v41, %v1940_v37  ;;  %v2010_v61 = vsel %vm659_vm0, %v1966_v54, 0.0 }
 0x766   : > { %v1955_v29 = vmul.f32 %v3489_v41, %v1931_v22  ;;  %v1953_v40 = vmul.f32 %v3489_v41, %v1929_v20 }
 0x767   : > { %v1941_v47 = vmax.f32 %v3494_v44, 0.0  ;;  %v2004_v48 = vsel %vm659_vm0, %v1964_v45, 0.0  ;;  %v1967_v49 = vmul.f32 %v3489_v41, %v1943_v43  ;;  %v1968_v45 = vsel %vm659_vm0, %v1952_v32, 0.0  ;;  %v2025_v32 = vld [vmem:[%s3609_s26 + $0x48] sm:$0xff] }
 0x768   : > { %2005 = vadd.xlane.f32.xlu1 %v2004_v48  ;;  %v1977_v35 = vsel %vm659_vm0, %v1955_v29, 0.0  ;;  %v1971_v48 = vsel %vm659_vm0, %v1953_v40, 0.0  ;;  %v2018_v29 = vld [vmem:[%s3609_s26 + $0x10] sm:$0xff] }
 0x769   : > { %v2013_v53 = vsel %vm659_vm0, %v1967_v49, 0.0  ;;  %v1965_v58 = vmul.f32 %v3489_v41, %v1941_v47 }
 0x76a   : > { %2014 = vadd.xlane.f32.xlu0 %v2013_v53 }
 0x76b   : > { %v2007_v1 = vsel %vm659_vm0, %v1965_v58, 0.0 }
 0x76c   : > { %1999 = vadd.xlane.f32.xlu1 %v1998_v57  ;;  %v2030_v57 = vld [vmem:[%s3609_s26 + $0x70] sm:$0xff] }
 0x76e   : > { %2011 = vadd.xlane.f32.xlu0 %v2010_v61 }
 0x770   : > { %2008 = vadd.xlane.f32.xlu1 %v2007_v1 }
 0x772   : > { %2002 = vadd.xlane.f32.xlu0 %v2001_v5  ;;  %v2027_v5 = vld [vmem:[%s3609_s26 + $0x58] sm:$0xff] }
 0x774   : > { %1993 = vadd.xlane.f32.xlu1 %v1992_v9 }
 0x776   : > { %1996 = vadd.xlane.f32.xlu0 %v1995_v13 }
 0x778   : > { %1987 = vadd.xlane.f32.xlu1 %v1986_v19 }
 0x77a   : > { %1990 = vadd.xlane.f32.xlu0 %v1989_v24 }
 0x77c   : > { %1981 = vadd.xlane.f32.xlu1 %v1980_v26 }
 0x77e   : > { %1984 = vadd.xlane.f32.xlu0 %v1983_v28 }
 0x780   : > { %1975 = vadd.xlane.f32.xlu1 %v1974_v30 }
 0x782   : > { %1978 = vadd.xlane.f32.xlu0 %v1977_v35 }
 0x784   : > { %1969 = vadd.xlane.f32.xlu1 %v1968_v45 }
 0x786   : > { %1972 = vadd.xlane.f32.xlu0 %v1971_v48  ;;  %v2016_v48 = vld [vmem:[%s3609_s26] sm:$0xff] }
 0x7f1   : > { %v2006_v49 = vpop.xlane.xlu1 %2005 }
 0x7f2   : > { %v2044_v2 = vmul.f32 %v2028_v62, %v2006_v49  ;;  %v2021_v62 = vld [vmem:[%s3609_s26 + $0x28] sm:$0xff] }
 0x7f3   : > { %v2015_v41 = vpop.xlane.xlu0 %2014 }
 0x7f4   : > { %v2047_v53 = vmul.f32 %v2031_v50, %v2015_v41  ;;  %v2024_v50 = vld [vmem:[%s3609_s26 + $0x40] sm:$0xff] }
 0x7f5   : > { %v2000_v54 = vpop.xlane.xlu1 %1999 }
 0x7f6   : > { %2127 = vperm.xlu0 %3013, %v2047_v53   ;;  %v2042_v24 = vmul.f32 %v2026_v14, %v2000_v54 }
 0x7f7   : > { %v2012_v58 = vpop.xlane.xlu0 %2011 }
 0x7f8   : > { %v2046_v61 = vmul.f32 %v2030_v57, %v2012_v58  ;;  %v2023_v57 = vld [vmem:[%s3609_s26 + $0x38] sm:$0xff] }
 0x7f9   : > { %v2009_v1 = vpop.xlane.xlu1 %2008 }
 0x7fa   : > { %2122 = vperm.xlu1 %3014, %v2046_v61   ;;  %v2045_v30 = vmul.f32 %v2029_v18, %v2009_v1 }
 0x7fb   : > { %v2003_v6 = vpop.xlane.xlu0 %2002 }
 0x7fc   : > { %v2043_v13 = vmul.f32 %v2027_v5, %v2003_v6  ;;  %v2019_v5 = vld [vmem:[%s3609_s26 + $0x18] sm:$0xff] }
 0x7fd   : > { %v1994_v9 = vpop.xlane.xlu1 %1993 }
 0x7fe   : > { %2112 = vperm.xlu1 %3014, %v2044_v2   ;;  %v2040_v54 = vmul.f32 %v2024_v50, %v1994_v9  ;;  %v2048_v9 = vld [vmem:[%s3726_s6] sm:$0xff] }
 0x7ff   : > { %v1997_v26 = vpop.xlane.xlu0 %1996  ;;  %2920 = vmatprep.mubr.f32.mxu0 %v2048_v9 }
 0x800   : > { %v2041_v49 = vmul.f32 %v2025_v32, %v1997_v26 }
 0x801   : > { %v1988_v15 = vpop.xlane.xlu1 %1987 }
 0x802   : > { %v2038_v19 = vmul.f32 %v2022_v10, %v1988_v15  ;;  %2107 = vperm.xlu1 %3014, %v2043_v13   ;;  %v2017_v10 = vld [vmem:[%s3609_s26 + $0x8] sm:$0xff]  ;;  %s3677_s26 = scalar_lea.hbm %s3729_s9, %s2586_s15 }
 0x803   : > { %v1991_v45 = vpop.xlane.xlu0 %1990 }
 0x804   : > { %2082 = vperm.xlu0 %3013, %v2038_v19   ;;  %v2039_v61 = vmul.f32 %v2023_v57, %v1991_v45 }
 0x805   : > { %v1982_v27 = vpop.xlane.xlu1 %1981 }
 0x806   : > { %v2036_v28 = vmul.f32 %v2020_v21, %v1982_v27  ;;  %2102 = vperm.xlu1 %3014, %v2042_v24  }
 0x807   : > { %v1985_v58 = vpop.xlane.xlu0 %1984 }
 0x808   : > { %2072 = vperm.xlu0 %3013, %v2036_v28   ;;  %v2037_v2 = vmul.f32 %v2021_v62, %v1985_v58 }
 0x809   : > { %v1976_v35 = vpop.xlane.xlu1 %1975 }
 0x80a   : > { %v2034_v40 = vmul.f32 %v2018_v29, %v1976_v35  ;;  %2117 = vperm.xlu1 %3014, %v2045_v30  }
 0x80b   : > { %v1979_v1 = vpop.xlane.xlu0 %1978 }
 0x80c   : > { %2062 = vperm.xlu0 %3013, %v2034_v40   ;;  %v2035_v6 = vmul.f32 %v2019_v5, %v1979_v1 }
 0x80d   : > { %v1970_v41 = vpop.xlane.xlu1 %1969 }
 0x80e   : > { %v2032_v53 = vmul.f32 %v2016_v48, %v1970_v41  ;;  %2097 = vperm.xlu1 %3014, %v2041_v49  }
 0x80f   : > { %v1973_v13 = vpop.xlane.xlu0 %1972 }
 0x810   : > { %2052 = vperm.xlu0 %3013, %v2032_v53   ;;  %v2033_v14 = vmul.f32 %v2017_v10, %v1973_v13 }
 0x812   : > { %2092 = vperm.xlu1 %3014, %v2040_v54  }
 0x816   : > { %2087 = vperm.xlu1 %3014, %v2039_v61  }
 0x81a   : > { %2077 = vperm.xlu1 %3014, %v2037_v2  }
 0x81e   : > { %2067 = vperm.xlu1 %3014, %v2035_v6  }
 0x822   : > { %2057 = vperm.xlu1 %3014, %v2033_v14  }
 0x871   : > { %v2128_v15 = vpop.permute.xlu0 %2127 }
 0x872   : > { %v2145_v19 = vmul.f32 %v2128_v15, %v1943_v43 }
 0x874   : > { %2888 = vmatprep.subr.mxu0 %v2145_v19 }
 0x875   : > { %2889 = vmatpush3.msra.mxu0 %v2145_v19  ;;  %v2123_v21 = vpop.permute.xlu1 %2122 }
 0x876   : > { %v2144_v24 = vmul.f32 %v2123_v21, %v1942_v42 }
 0x878   : > { %2890 = vmatprep.subr.mxu0 %v2144_v24 }
 0x879   : > { %2891 = vmatpush3.msra.mxu0 %v2144_v24  ;;  %v2113_v18 = vpop.permute.xlu1 %2112 }
 0x87a   : > { %v2142_v30 = vmul.f32 %v2113_v18, %v1940_v37 }
 0x87d   : > { %v2108_v26 = vpop.permute.xlu1 %2107 }
 0x87e   : > { %v2141_v43 = vmul.f32 %v2108_v26, %v1939_v51 }
 0x87f   : > { %v2083_v33 = vpop.permute.xlu0 %2082 }
 0x880   : > { %v2136_v31 = vmul.f32 %v2083_v33, %v1934_v63 }
 0x881   : > { %v2103_v27 = vpop.permute.xlu1 %2102 }
 0x882   : > { %v2140_v42 = vmul.f32 %v2103_v27, %v1938_v36 }
 0x883   : > { %v2073_v37 = vpop.permute.xlu0 %2072 }
 0x884   : > { %v2134_v52 = vmul.f32 %v2073_v37, %v1932_v8  ;;  %v2221_v8 = vld [vmem:[#allocation6] sm:$0xff] }
 0x885   : > { %v2118_v28 = vpop.permute.xlu1 %2117 }
 0x886   : > { %v2143_v29 = vmul.f32 %v2118_v28, %v1941_v47 }
 0x887   : > { %v2063_v46 = vpop.permute.xlu0 %2062 }
 0x888   : > { %2892 = vmatprep.subr.mxu0 %v2143_v29  ;;  %v2132_v55 = vmul.f32 %v2063_v46, %v1930_v16  ;;  %v2576_v16 = vld [vmem:[%s3728_s8] ss:$0 sm:$0xff] }
 0x889   : > { %2893 = vmatpush3.msra.mxu0 %v2143_v29  ;;  %v2098_v38 = vpop.permute.xlu1 %2097 }
 0x88a   : > { %2894 = vmatprep.subr.mxu0 %v2142_v30  ;;  %v2139_v44 = vmul.f32 %v2098_v38, %v1937_v60 }
 0x88b   : > { %2895 = vmatpush3.msra.mxu0 %v2142_v30  ;;  %v2053_v60 = vpop.permute.xlu0 %2052 }
 0x88c   : > { %2896 = vmatprep.subr.mxu0 %v2141_v43  ;;  %v2130_v0 = vmul.f32 %v2053_v60, %v1928_v25 }
 0x88d   : > { %2897 = vmatpush3.msra.mxu0 %v2141_v43  ;;  %v2093_v32 = vpop.permute.xlu1 %2092 }
 0x88e   : > { %2898 = vmatprep.subr.mxu0 %v2140_v42  ;;  %v2138_v34 = vmul.f32 %v2093_v32, %v1936_v56 }
 0x88f   : > { %2899 = vmatpush3.msra.mxu0 %v2140_v42 }
 0x890   : > { %2900 = vmatprep.subr.mxu0 %v2139_v44 }
 0x891   : > { %2901 = vmatpush3.msra.mxu0 %v2139_v44  ;;  %v2088_v39 = vpop.permute.xlu1 %2087 }
 0x892   : > { %v2137_v47 = vmul.f32 %v2088_v39, %v1935_v3  ;;  %2902 = vmatprep.subr.mxu0 %v2138_v34 }
 0x893   : > { %2903 = vmatpush3.msra.mxu0 %v2138_v34 }
 0x894   : > { %2904 = vmatprep.subr.mxu0 %v2137_v47 }
 0x895   : > { %2905 = vmatpush3.msra.mxu0 %v2137_v47  ;;  %v2078_v36 = vpop.permute.xlu1 %2077 }
 0x896   : > { %v2135_v51 = vmul.f32 %v2078_v36, %v1933_v12  ;;  %2906 = vmatprep.subr.mxu0 %v2136_v31 }
 0x897   : > { %2907 = vmatpush3.msra.mxu0 %v2136_v31 }
 0x898   : > { %2908 = vmatprep.subr.mxu0 %v2135_v51 }
 0x899   : > { %2909 = vmatpush3.msra.mxu0 %v2135_v51  ;;  %v2068_v56 = vpop.permute.xlu1 %2067 }
 0x89a   : > { %v2133_v59 = vmul.f32 %v2068_v56, %v1931_v22  ;;  %2910 = vmatprep.subr.mxu0 %v2134_v52 }
 0x89b   : > { %2911 = vmatpush3.msra.mxu0 %v2134_v52 }
 0x89c   : > { %2912 = vmatprep.subr.mxu0 %v2133_v59 }
 0x89d   : > { %2913 = vmatpush3.msra.mxu0 %v2133_v59  ;;  %v2058_v63 = vpop.permute.xlu1 %2057 }
 0x89e   : > { %v2131_v3 = vmul.f32 %v2058_v63, %v1929_v20  ;;  %2914 = vmatprep.subr.mxu0 %v2132_v55 }
 0x89f   : > { %2915 = vmatpush3.msra.mxu0 %v2132_v55 }
 0x8a0   : > { %2916 = vmatprep.subr.mxu0 %v2131_v3 }
 0x8a1   : > { %2917 = vmatpush3.msra.mxu0 %v2131_v3 }
 0x8a2   : > { %2918 = vmatprep.subr.mxu0 %v2130_v0 }
 0x8a3   : > { %2919 = vmatpush3.msra.mxu0 %v2130_v0 }
 0x8a4   : > { %2921 = vmatmul.mubr.f32.vlgmr.msra.gmra.mxu0 %v2049_v4  ;;  %2923 = vmatprep.subr.mxu0 %v2222_v7 }
 0x8a5   : > { %2924 = vmatpush3.msra.mxu0 %v2222_v7 }
 0x8a6   : > { %2925 = vmatprep.subr.mxu0 %v2221_v8 }
 0x8a7   : > { %2926 = vmatpush3.msra.mxu0 %v2221_v8 }
 0x964   : > { %v2922_v11 = vpop.f32.mrf.mxu0 }
 0x966   : > { %v2212_v12 = vpop.f32.mrf.mxu0 }
 0x967   : > { %2927 = vmatprep.mubr.msk.f32.mxu0 %vm659_vm0, %v2212_v12 }
 0x968   : > { %2928 = vmatmul.mubr.msk.f32.vlgmr.msra.gmra.mxu0 %vm659_vm0, %v2922_v11 }
 0xa28   : > { %v2929_v17 = vpop.f32.mrf.mxu0 }
 0xa29   : > { %v2308_v22 = vadd.f32 %v2929_v17, %v2576_v16 }
 0xa2a   : > { %v2302_v23 = vpop.f32.mrf.mxu0 }
 0xa2b   : > { %2312 = vst [vmem:[%s575_s17 + $0x8] sm:$0xff] %v2308_v22  ;;  %v2303_v25 = vadd.f32 %v2576_v16, %v2302_v23 }
 0xa2d   : > { %2311 = vst [vmem:[%s575_s17] sm:$0xff] %v2303_v25 }
 0xa2e   : > { %3117 = shalt.err (!%p3114_p5)
}
 0xa2f   : > { %s3118_s29 = scalar_lea.hbm %s3677_s26, 256  ;;  %s3122_s17 = scalar_lea.hbm %s3729_s9, 512 }
 0xa30   : > { %p3119_p6 = scmp.ne.s32.totalorder %s3677_s26, %s3118_s29  ;;  %p3123_p12 = scmp.lt.s32.totalorder %s3677_s26, %s3729_s9 }
 0xa31   : > { %p3124_p0 = scmp.lt.s32.totalorder %s3122_s17, %s3118_s29 }
 0xa32   : > { %p3120_p10 = pnand %p3119_p6, %p3745_p9 }
 0xa33   : > { %p3125_p1 = por %p3124_p0, %p3123_p12 }
 0xa34   : > { %p3121_p11 = pneg %p3120_p10 }
 0xa36   : > { %p3126_p13 = pnand %p3125_p1, %p3121_p11 }
 0xa38   : > { %3129 = shalt.err (!%p3126_p13)
}
 0xa39   : > { %s3182_s23 = smov 128   ;;  %s3183_s28 = smov 8  }
 0xa3a   : > { %2954 = dma.vmem_to_hbm [thread:$0]  (%p3745_p9), %s3672_s25, 256, %s3677_s26, %s2314_s22, %s3182_s23, %s3182_s23, %s3183_s28  }
 0xa3b PF: > { %s2342_s13 = sand.u32 1, %s3160_s30   ;;  %p3746_p2 = scmp.ne.s32.totalorder %s3738_s21, 0 }
 0xa3c   : > { %s2343_s24 = scalar_lea.sflag [#allocation5], %s2342_s13 }
 0xa3d   : > { %p2964_p3 = pnand %p2457_p8, %p3746_p2 }
 0xa3f   : > { %p2965_p7 = pneg %p2964_p3 }
 0xa41   : > { %3155 = dma.done.wait (%p2965_p7), %s2343_s24, 256  }
 0xa42   : > { %3157 = vsyncadd (%p2965_p7), %s2343_s24, 4294967040  ;;  %s3747_s12 = sld [smem:[#allocation12_spill]]  ;;  %s3749_s30 = smov %s3164_s10 }
 0xa43   : > { %s3748_s27 = sld [smem:[#allocation13_spill]]  ;;  %s3750_s10 = smov %s3168_s11 }
 0xa48   : > { %p21_p4 = scmp.ge.s32.totalorder %s3747_s12, 4  }
 0xa49   : > { %s3751_s11 = smov %s3748_s27 }
 0xa4a   :  { %23 = sbr.rel (!%p21_p4) target bundleno = 5 (0x5), region = 165 }
 0xa4f   :  { %2348 = vsyncpa [#allocation4], 1 }
 0xa50   :  { %2350 = vsyncpa [#allocation4 + $0x1], 1 }
 0xa51   :  { %2351 = vsyncpa [#allocation7], 1 }
 0xa52   :  { %2352 = vsyncpa [#allocation5], 1 }
 0xa53   :  { %2354 = vsyncpa [#allocation5 + $0x1], 1 }

</bundles_post_ra>
